<compile_context>
chip_gen: v6e
topology: v6e:2x2x1
jax: 0.10.0
libtpu: 0.0.40
codegen_flags: <defaults>
</compile_context>

<pallas_src>
import numpy as np
import jax
import jax.numpy as jnp
from jax.experimental import pallas as pl
from jax.experimental.pallas import tpu as pltpu

BN_EPS = 1e-5
LRELU_SLOPE = 0.2
_LANE = 128            # lane width (output-channel padding granularity)
_TM = 512              # max row-tile size (multiple of 16 for bf16 sublanes)
_REF_PRECISION = jax.lax.Precision.HIGHEST   # reference only

_PARALLEL = pltpu.CompilerParams(dimension_semantics=("parallel",))


def _round_up(x, m):
    return ((x + m - 1) // m) * m


# ---------------------------------------------------------------- kernels ---
def _matmul_lrelu_kernel(p_ref, w_ref, o_ref):
    y = jnp.dot(p_ref[...], w_ref[...], preferred_element_type=jnp.float32)
    o_ref[...] = jnp.maximum(y, LRELU_SLOPE * y).astype(o_ref.dtype)


def _matmul_stats_kernel(p_ref, w_ref, y_ref, sum_ref, sq_ref):
    # conv matmul + per-tile partial BN statistics; y is emitted in bf16 but
    # the stats come from the f32 accumulator (padded rows contribute zeros).
    y = jnp.dot(p_ref[...], w_ref[...], preferred_element_type=jnp.float32)
    y_ref[...] = y.astype(y_ref.dtype)
    sum_ref[...] = jnp.sum(y, axis=0, keepdims=True)[None]
    sq_ref[...] = jnp.sum(y * y, axis=0, keepdims=True)[None]


def _bn_lrelu_kernel(y_ref, scale_ref, shift_ref, o_ref):
    # per-channel affine (gamma/rsqrt(var) folded into scale, mean into shift)
    z = y_ref[...].astype(jnp.float32) * scale_ref[...] + shift_ref[...]
    o_ref[...] = jnp.maximum(z, LRELU_SLOPE * z).astype(o_ref.dtype)


def _tail_kernel(y_ref, scale_ref, shift_ref, w5_ref, sel_ref, o_ref):
    # Fused: conv4 BN affine + LeakyReLU + conv5 (per-sample dot product over
    # the 4x4 map, row-aligned with y) + sigmoid.
    z = y_ref[...].astype(jnp.float32) * scale_ref[...] + shift_ref[...]
    z = jnp.maximum(z, LRELU_SLOPE * z)
    prod = z * w5_ref[...]                                   # (Mp, Cp) f32
    per = jnp.dot(sel_ref[...], prod,
                  preferred_element_type=jnp.float32)        # (N, Cp)
    o_ref[...] = jax.nn.sigmoid(jnp.sum(per, axis=1, keepdims=True))


# --------------------------------------------------------------- wrappers ---
def _pad_rows(patches):
    """Zero-pad M to a tile multiple; guarantee >=2 grid steps when M > 16."""
    M = patches.shape[0]
    if M > 16:
        tm = min(_TM, _round_up(pl.cdiv(M, 2), 16))
    else:
        tm = _round_up(max(M, 1), 16)
    Mp = _round_up(M, tm)
    if Mp != M:
        patches = jnp.pad(patches, ((0, Mp - M), (0, 0)))
    return patches, M, tm


def _prep_weight(w_oihw):
    """OIHW conv weight -> bf16 [kH*kW*Cin, Cout(+pad)] + true Cout.

    Lane padding is only applied when the blow-up factor is <= 2x; otherwise
    masked stores are cheaper than the padded writeback + channel slice.
    """
    cout = w_oihw.shape[0]
    w = jnp.transpose(w_oihw, (2, 3, 1, 0)).reshape(-1, cout)   # [K, Cout]
    cpad = _round_up(cout, _LANE)
    if cpad > 2 * cout:
        cpad = cout
    if cpad != cout:
        w = jnp.pad(w, ((0, 0), (0, cpad - cout)))
    return w.astype(jnp.bfloat16), cout


def _trim(out, M, cout):
    if out.shape[0] != M or out.shape[1] != cout:
        out = out[:M, :cout]
    return out


def _conv_lrelu_layer(patches, w_mat, cout):
    """conv matmul + LeakyReLU, bf16 out."""
    patches, M, tm = _pad_rows(patches)
    Mp, K = patches.shape
    Cp = w_mat.shape[1]
    out = pl.pallas_call(
        _matmul_lrelu_kernel,
        out_shape=jax.ShapeDtypeStruct((Mp, Cp), jnp.bfloat16),
        grid=(Mp // tm,),
        in_specs=[pl.BlockSpec((tm, K), lambda i: (i, 0)),
                  pl.BlockSpec((K, Cp), lambda i: (0, 0))],
        out_specs=pl.BlockSpec((tm, Cp), lambda i: (i, 0)),
        compiler_params=_PARALLEL,
        cost_estimate=pl.CostEstimate(
            flops=2 * Mp * K * Cp, transcendentals=0,
            bytes_accessed=2 * (Mp * K + K * Cp + Mp * Cp)),
    )(patches, w_mat)
    return _trim(out, M, cout)


def _matmul_stats(patches, w_mat, tm):
    """Pass 1: conv matmul (bf16 out) + per-tile partial BN statistics."""
    Mp, K = patches.shape
    Cp = w_mat.shape[1]
    nt = Mp // tm
    return pl.pallas_call(
        _matmul_stats_kernel,
        out_shape=(jax.ShapeDtypeStruct((Mp, Cp), jnp.bfloat16),
                   jax.ShapeDtypeStruct((nt, 1, Cp), jnp.float32),
                   jax.ShapeDtypeStruct((nt, 1, Cp), jnp.float32)),
        grid=(nt,),
        in_specs=[pl.BlockSpec((tm, K), lambda i: (i, 0)),
                  pl.BlockSpec((K, Cp), lambda i: (0, 0))],
        out_specs=(pl.BlockSpec((tm, Cp), lambda i: (i, 0)),
                   pl.BlockSpec((1, 1, Cp), lambda i: (i, 0, 0)),
                   pl.BlockSpec((1, 1, Cp), lambda i: (i, 0, 0))),
        compiler_params=_PARALLEL,
        cost_estimate=pl.CostEstimate(
            flops=2 * Mp * K * Cp, transcendentals=0,
            bytes_accessed=2 * (Mp * K + K * Cp + Mp * Cp) + 8 * nt * Cp),
    )(patches, w_mat)


def _bn_fold(psum, psq, M, gamma, beta, cout, Cp):
    """Tiny cross-tile reduction; fold gamma/beta into per-channel scale/shift."""
    mean = jnp.sum(psum, axis=(0, 1)) / M
    ex2 = jnp.sum(psq, axis=(0, 1)) / M
    # NOTE: E[x^2]-mean^2 in f32, clamped; fine at these scales.
    var = jnp.maximum(ex2 - mean * mean, 0.0)
    g = gamma.astype(jnp.float32)
    b = beta.astype(jnp.float32)
    if Cp != cout:
        g = jnp.pad(g, (0, Cp - cout))
        b = jnp.pad(b, (0, Cp - cout))
    scale = g * jax.lax.rsqrt(var + BN_EPS)
    shift = b - mean * scale
    return scale.reshape(1, Cp), shift.reshape(1, Cp)


def _conv_bn_lrelu_layer(patches, w_mat, gamma, beta, cout):
    """conv matmul + training-mode BatchNorm (two tiled passes) + LeakyReLU."""
    patches, M, tm = _pad_rows(patches)
    Mp, _ = patches.shape
    Cp = w_mat.shape[1]
    y, psum, psq = _matmul_stats(patches, w_mat, tm)
    scale, shift = _bn_fold(psum, psq, M, gamma, beta, cout, Cp)
    out = pl.pallas_call(
        _bn_lrelu_kernel,
        out_shape=jax.ShapeDtypeStruct((Mp, Cp), jnp.bfloat16),
        grid=(Mp // tm,),
        in_specs=[pl.BlockSpec((tm, Cp), lambda i: (i, 0)),
                  pl.BlockSpec((1, Cp), lambda i: (0, 0)),
                  pl.BlockSpec((1, Cp), lambda i: (0, 0))],
        out_specs=pl.BlockSpec((tm, Cp), lambda i: (i, 0)),
        compiler_params=_PARALLEL,
    )(y, scale, shift)
    return _trim(out, M, cout)


def _fused_tail(patches, w_mat, gamma, beta, cout, w5_map, n_batch):
    """conv4 matmul+stats, then fused BN4 + LeakyReLU + conv5 + sigmoid.

    conv5 is 4x4/s1/p0 over a 4x4 feature map with Cout=1, i.e. a per-sample
    dot product between the conv4 activation and the conv5 weight; it fits in
    one pallas_call together with the BN affine, LeakyReLU and sigmoid.
    """
    patches, M, tm = _pad_rows(patches)
    Mp, _ = patches.shape
    Cp = w_mat.shape[1]
    y, psum, psq = _matmul_stats(patches, w_mat, tm)
    scale, shift = _bn_fold(psum, psq, M, gamma, beta, cout, Cp)

    per = M // n_batch                      # spatial positions per sample (16)
    if Cp != cout:
        w5_map = jnp.pad(w5_map, ((0, 0), (0, Cp - cout)))
    w5t = jnp.tile(w5_map, (n_batch, 1))    # row-aligned with y's (oh,ow) rows
    if Mp != M:
        w5t = jnp.pad(w5t, ((0, Mp - M), (0, 0)))
    rows = jnp.arange(Mp)
    sel = (rows[None, :] // per == jnp.arange(n_batch)[:, None]).astype(jnp.float32)

    return pl.pallas_call(
        _tail_kernel,
        out_shape=jax.ShapeDtypeStruct((n_batch, 1), jnp.float32),
        grid=(1,),
        in_specs=[pl.BlockSpec((Mp, Cp), lambda i: (0, 0)),
                  pl.BlockSpec((1, Cp), lambda i: (0, 0)),
                  pl.BlockSpec((1, Cp), lambda i: (0, 0)),
                  pl.BlockSpec((Mp, Cp), lambda i: (0, 0)),
                  pl.BlockSpec((n_batch, Mp), lambda i: (0, 0))],
        out_specs=pl.BlockSpec((n_batch, 1), lambda i: (0, 0)),
    )(y, scale, shift, w5t, sel)


def _im2col(x_nhwc, k, stride, pad):
    """NHWC -> ([N*OH*OW, k*k*C] patches, (N, OH, OW)). Pure data movement."""
    N, H, W, C = x_nhwc.shape
    xp = jnp.pad(x_nhwc, ((0, 0), (pad, pad), (pad, pad), (0, 0)))
    OH = (H + 2 * pad - k) // stride + 1
    OW = (W + 2 * pad - k) // stride + 1
    cols = []
    for ky in range(k):
        for kx in range(k):
            cols.append(xp[:, ky:ky + stride * OH:stride,
                           kx:kx + stride * OW:stride, :])
    patches = jnp.concatenate(cols, axis=-1)          # [N, OH, OW, k*k*C]
    return patches.reshape(N * OH * OW, k * k * C), (N, OH, OW)


def prepare_params(params):
    """One-time weight prep (hoisted out of the per-forward jit path)."""
    prep = {}
    couts = []
    for i in (1, 2, 3, 4):
        w, c = _prep_weight(params[f"w{i}"])
        prep[f"w{i}"] = w
        couts.append(c)
    for i in (2, 3, 4):
        prep[f"g{i}"] = params[f"g{i}"].astype(jnp.float32)
        prep[f"b{i}"] = params[f"b{i}"].astype(jnp.float32)
    # conv5 (Cout=1) as a dot-product map whose rows align with conv4's rows.
    c4 = params["w5"].shape[1]
    prep["w5_map"] = (jnp.transpose(params["w5"], (2, 3, 1, 0))
                      .reshape(16, c4).astype(jnp.float32))
    return prep, tuple(couts)


def discriminator_forward(x_nchw, prep, couts):
    """Pallas implementation of Discriminator.forward (training-mode BN)."""
    c1, c2, c3, c4 = couts
    x = jnp.transpose(x_nchw, (0, 2, 3, 1)).astype(jnp.bfloat16)   # NHWC bf16

    # conv1 -> LeakyReLU
    p, (N, OH, OW) = _im2col(x, 4, 2, 1)
    x = _conv_lrelu_layer(p, prep["w1"], c1).reshape(N, OH, OW, c1)

    # conv2 / conv3 -> BatchNorm -> LeakyReLU
    for i, c in ((2, c2), (3, c3)):
        p, (N, OH, OW) = _im2col(x, 4, 2, 1)
        x = _conv_bn_lrelu_layer(p, prep[f"w{i}"], prep[f"g{i}"],
                                 prep[f"b{i}"], c).reshape(N, OH, OW, c)

    # conv4 -> BN -> LeakyReLU -> conv5 (4x4/s1/p0) -> Sigmoid, fused tail.
    p, _ = _im2col(x, 4, 2, 1)
    out = _fused_tail(p, prep["w4"], prep["g4"], prep["b4"], c4,
                      prep["w5_map"], N)
    return out.reshape(N, 1, 1, 1).astype(jnp.float32)              # NCHW


# --------------------------------------------------------- pure-JAX reference
def reference_forward(x, params):
    def conv(h, w, stride, pad):
        return jax.lax.conv_general_dilated(
            h, w, (stride, stride), [(pad, pad), (pad, pad)],
            dimension_numbers=("NCHW", "OIHW", "NCHW"),
            precision=_REF_PRECISION)

    def bn(h, g, b):
        mean = jnp.mean(h, axis=(0, 2, 3), keepdims=True)
        var = jnp.mean(jnp.square(h - mean), axis=(0, 2, 3), keepdims=True)
        return ((h - mean) * jax.lax.rsqrt(var + BN_EPS)
                * g.reshape(1, -1, 1, 1) + b.reshape(1, -1, 1, 1))

    def lrelu(h):
        return jnp.where(h >= 0, h, LRELU_SLOPE * h)

    h = lrelu(conv(x, params["w1"], 2, 1))
    h = lrelu(bn(conv(h, params["w2"], 2, 1), params["g2"], params["b2"]))
    h = lrelu(bn(conv(h, params["w3"], 2, 1), params["g3"], params["b3"]))
    h = lrelu(bn(conv(h, params["w4"], 2, 1), params["g4"], params["b4"]))
    return jax.nn.sigmoid(conv(h, params["w5"], 1, 0))


# ------------------------------------------------------------------- main ---
def make_params(key, nc, ndf):
    """DCGAN-style init: conv ~ N(0, 0.02), BN gamma ~ N(1, 0.02), beta = 0."""
    ks = jax.random.split(key, 8)
    return {
        "w1": 0.02 * jax.random.normal(ks[0], (ndf, nc, 4, 4), jnp.float32),
        "w2": 0.02 * jax.random.normal(ks[1], (ndf * 2, ndf, 4, 4), jnp.float32),
        "w3": 0.02 * jax.random.normal(ks[2], (ndf * 4, ndf * 2, 4, 4), jnp.float32),
        "w4": 0.02 * jax.random.normal(ks[3], (ndf * 8, ndf * 4, 4, 4), jnp.float32),
        "w5": 0.02 * jax.random.normal(ks[4], (1, ndf * 8, 4, 4), jnp.float32),
        "g2": 1.0 + 0.02 * jax.random.normal(ks[5], (ndf * 2,), jnp.float32),
        "g3": 1.0 + 0.02 * jax.random.normal(ks[6], (ndf * 4,), jnp.float32),
        "g4": 1.0 + 0.02 * jax.random.normal(ks[7], (ndf * 8,), jnp.float32),
        "b2": jnp.zeros((ndf * 2,), jnp.float32),
        "b3": jnp.zeros((ndf * 4,), jnp.float32),
        "b4": jnp.zeros((ndf * 8,), jnp.float32),
    }


if __name__ == "__main__":
    # Final 4x4/s1/p0 conv needs a 64x64 input (64 -> 32 -> 16 -> 8 -> 4 -> 1).
    batch, nc, ndf, spatial = 2, 3, 8, 64

    key = jax.random.PRNGKey(0)
    kx, kp = jax.random.split(key)
    x = jax.random.normal(kx, (batch, nc, spatial, spatial), jnp.float32)
    params = make_params(kp, nc, ndf)

    prep, couts = prepare_params(params)                 # one-time, outside jit
    fwd = jax.jit(discriminator_forward, static_argnums=2)
    out = jax.block_until_ready(fwd(x, prep, couts))

    assert out.shape == (batch, 1, 1, 1), out.shape
    assert out.dtype == jnp.float32

    ref = jax.block_until_ready(jax.jit(reference_forward)(x, params))
    # bf16 activations + bf16 BN intermediate vs HIGHEST-precision f32 reference.
    if not np.allclose(np.asarray(out), np.asarray(ref), rtol=2e-2, atol=2e-2):
        raise AssertionError("Pallas output does not match reference")

    print("KERNEL_OK")
</pallas_src>

<mosaic_0001>
module attributes {stable_mosaic.version = 11 : i64} {
  func.func @_matmul_lrelu_kernel(%arg0: i32, %arg1: memref<512x48xbf16, #tpu.memory_space<vmem>>, %arg2: memref<48x8xbf16, #tpu.memory_space<vmem>>, %arg3: memref<512x8xbf16, #tpu.memory_space<vmem>>) attributes {dimension_semantics = [#tpu.dimension_semantics<parallel>], iteration_bounds = array<i64: 4>, scalar_prefetch = 0 : i64, scratch_operands = 0 : i64, tpu.core_type = #tpu.core_type<tc>, window_params = [{transform_indices = @transform_0, window_bounds = array<i64: 512, 48>}, {pipeline_mode = #tpu.pipeline_mode<synchronous>, transform_indices = @transform_1, window_bounds = array<i64: 48, 8>}, {transform_indices = @transform_2, window_bounds = array<i64: 512, 8>}]} {
    %c0 = arith.constant 0 : index
    %c0_0 = arith.constant 0 : index
    %0 = vector.load %arg1[%c0, %c0_0] : memref<512x48xbf16, #tpu.memory_space<vmem>>, vector<512x48xbf16>
    %c0_1 = arith.constant 0 : index
    %c0_2 = arith.constant 0 : index
    %1 = vector.load %arg2[%c0_1, %c0_2] : memref<48x8xbf16, #tpu.memory_space<vmem>>, vector<48x8xbf16>
    %cst = arith.constant dense<0.000000e+00> : vector<512x8xf32>
    %2 = tpu.matmul %0, %1, %cst {dimension_numbers = #tpu.dot_dimension_numbers<[1], [0], [0], [1], [0, 0, 1, 1], [], []>} : vector<512x48xbf16>, vector<48x8xbf16>, vector<512x8xf32> -> vector<512x8xf32>
    %cst_3 = arith.constant 2.000000e-01 : f32
    %3 = vector.broadcast %cst_3 : f32 to vector<512x8xf32>
    %4 = arith.mulf %3, %2 : vector<512x8xf32>
    %5 = arith.maximumf %2, %4 : vector<512x8xf32>
    %6 = arith.truncf %5 : vector<512x8xf32> to vector<512x8xbf16>
    %c0_4 = arith.constant 0 : index
    %c0_5 = arith.constant 0 : index
    %7 = vector.load %arg3[%c0_4, %c0_5] : memref<512x8xbf16, #tpu.memory_space<vmem>>, vector<512x8xbf16>
    tpu.vector_store %arg3[%c0_4, %c0_5], %6 {strides = array<i32>} : memref<512x8xbf16, #tpu.memory_space<vmem>>, vector<512x8xbf16>,
    return
  }
  func.func @transform_0(%arg0: i32) -> (i32, i32) {
    %c0_i32 = arith.constant 0 : i32
    %c0_i32_0 = arith.constant 0 : i32
    return %arg0, %c0_i32 : i32, i32
  }
  func.func @transform_1(%arg0: i32) -> (i32, i32) {
    %c0_i32 = arith.constant 0 : i32
    %c0_i32_0 = arith.constant 0 : i32
    %c0_i32_1 = arith.constant 0 : i32
    return %c0_i32, %c0_i32_0 : i32, i32
  }
  func.func @transform_2(%arg0: i32) -> (i32, i32) {
    %c0_i32 = arith.constant 0 : i32
    %c0_i32_0 = arith.constant 0 : i32
    return %arg0, %c0_i32 : i32, i32
  }
}

module attributes {stable_mosaic.version = 11 : i64} {
  func.func @_matmul_stats_kernel(%arg0: i32, %arg1: memref<256x128xbf16, #tpu.memory_space<vmem>>, %arg2: memref<128x16xbf16, #tpu.memory_space<vmem>>, %arg3: memref<256x16xbf16, #tpu.memory_space<vmem>>, %arg4: memref<1x1x16xf32, #tpu.memory_space<vmem>>, %arg5: memref<1x1x16xf32, #tpu.memory_space<vmem>>) attributes {dimension_semantics = [#tpu.dimension_semantics<parallel>], iteration_bounds = array<i64: 2>, scalar_prefetch = 0 : i64, scratch_operands = 0 : i64, tpu.core_type = #tpu.core_type<tc>, window_params = [{transform_indices = @transform_0, window_bounds = array<i64: 256, 128>}, {pipeline_mode = #tpu.pipeline_mode<synchronous>, transform_indices = @transform_1, window_bounds = array<i64: 128, 16>}, {transform_indices = @transform_2, window_bounds = array<i64: 256, 16>}, {transform_indices = @transform_3, window_bounds = array<i64: 1, 1, 16>}, {transform_indices = @transform_4, window_bounds = array<i64: 1, 1, 16>}]} {
    %c0 = arith.constant 0 : index
    %c0_0 = arith.constant 0 : index
    %0 = vector.load %arg1[%c0, %c0_0] : memref<256x128xbf16, #tpu.memory_space<vmem>>, vector<256x128xbf16>
    %c0_1 = arith.constant 0 : index
    %c0_2 = arith.constant 0 : index
    %1 = vector.load %arg2[%c0_1, %c0_2] : memref<128x16xbf16, #tpu.memory_space<vmem>>, vector<128x16xbf16>
    %cst = arith.constant dense<0.000000e+00> : vector<256x16xf32>
    %2 = tpu.matmul %0, %1, %cst {dimension_numbers = #tpu.dot_dimension_numbers<[1], [0], [0], [1], [0, 0, 1, 1], [], []>} : vector<256x128xbf16>, vector<128x16xbf16>, vector<256x16xf32> -> vector<256x16xf32>
    %3 = arith.truncf %2 : vector<256x16xf32> to vector<256x16xbf16>
    %c0_3 = arith.constant 0 : index
    %c0_4 = arith.constant 0 : index
    %4 = vector.load %arg3[%c0_3, %c0_4] : memref<256x16xbf16, #tpu.memory_space<vmem>>, vector<256x16xbf16>
    tpu.vector_store %arg3[%c0_3, %c0_4], %3 {strides = array<i32>} : memref<256x16xbf16, #tpu.memory_space<vmem>>, vector<256x16xbf16>,
    %cst_5 = arith.constant dense<0.000000e+00> : vector<16xf32>
    %5 = vector.multi_reduction <add>, %2, %cst_5 [0] : vector<256x16xf32> to vector<16xf32>
    %6 = vector.shape_cast %5 : vector<16xf32> to vector<1x16xf32>
    %7 = vector.shape_cast %6 : vector<1x16xf32> to vector<1x1x16xf32>
    %c0_6 = arith.constant 0 : index
    %c0_7 = arith.constant 0 : index
    %c0_8 = arith.constant 0 : index
    %8 = vector.load %arg4[%c0_6, %c0_7, %c0_8] : memref<1x1x16xf32, #tpu.memory_space<vmem>>, vector<1x1x16xf32>
    tpu.vector_store %arg4[%c0_6, %c0_7, %c0_8], %7 {strides = array<i32>} : memref<1x1x16xf32, #tpu.memory_space<vmem>>, vector<1x1x16xf32>,
    %9 = arith.mulf %2, %2 : vector<256x16xf32>
    %cst_9 = arith.constant dense<0.000000e+00> : vector<16xf32>
    %10 = vector.multi_reduction <add>, %9, %cst_9 [0] : vector<256x16xf32> to vector<16xf32>
    %11 = vector.shape_cast %10 : vector<16xf32> to vector<1x16xf32>
    %12 = vector.shape_cast %11 : vector<1x16xf32> to vector<1x1x16xf32>
    %c0_10 = arith.constant 0 : index
    %c0_11 = arith.constant 0 : index
    %c0_12 = arith.constant 0 : index
    %13 = vector.load %arg5[%c0_10, %c0_11, %c0_12] : memref<1x1x16xf32, #tpu.memory_space<vmem>>, vector<1x1x16xf32>
    tpu.vector_store %arg5[%c0_10, %c0_11, %c0_12], %12 {strides = array<i32>} : memref<1x1x16xf32, #tpu.memory_space<vmem>>, vector<1x1x16xf32>,
    return
  }
  func.func @transform_0(%arg0: i32) -> (i32, i32) {
    %c0_i32 = arith.constant 0 : i32
    %c0_i32_0 = arith.constant 0 : i32
    return %arg0, %c0_i32 : i32, i32
  }
  func.func @transform_1(%arg0: i32) -> (i32, i32) {
    %c0_i32 = arith.constant 0 : i32
    %c0_i32_0 = arith.constant 0 : i32
    %c0_i32_1 = arith.constant 0 : i32
    return %c0_i32, %c0_i32_0 : i32, i32
  }
  func.func @transform_2(%arg0: i32) -> (i32, i32) {
    %c0_i32 = arith.constant 0 : i32
    %c0_i32_0 = arith.constant 0 : i32
    return %arg0, %c0_i32 : i32, i32
  }
  func.func @transform_3(%arg0: i32) -> (i32, i32, i32) {
    %c0_i32 = arith.constant 0 : i32
    %c0_i32_0 = arith.constant 0 : i32
    %c0_i32_1 = arith.constant 0 : i32
    return %arg0, %c0_i32, %c0_i32_0 : i32, i32, i32
  }
  func.func @transform_4(%arg0: i32) -> (i32, i32, i32) {
    %c0_i32 = arith.constant 0 : i32
    %c0_i32_0 = arith.constant 0 : i32
    %c0_i32_1 = arith.constant 0 : i32
    return %arg0, %c0_i32, %c0_i32_0 : i32, i32, i32
  }
}

module attributes {stable_mosaic.version = 11 : i64} {
  func.func @_bn_lrelu_kernel(%arg0: i32, %arg1: memref<256x16xbf16, #tpu.memory_space<vmem>>, %arg2: memref<1x16xf32, #tpu.memory_space<vmem>>, %arg3: memref<1x16xf32, #tpu.memory_space<vmem>>, %arg4: memref<256x16xbf16, #tpu.memory_space<vmem>>) attributes {dimension_semantics = [#tpu.dimension_semantics<parallel>], iteration_bounds = array<i64: 2>, scalar_prefetch = 0 : i64, scratch_operands = 0 : i64, tpu.core_type = #tpu.core_type<tc>, window_params = [{transform_indices = @transform_0, window_bounds = array<i64: 256, 16>}, {pipeline_mode = #tpu.pipeline_mode<synchronous>, transform_indices = @transform_1, window_bounds = array<i64: 1, 16>}, {pipeline_mode = #tpu.pipeline_mode<synchronous>, transform_indices = @transform_2, window_bounds = array<i64: 1, 16>}, {transform_indices = @transform_3, window_bounds = array<i64: 256, 16>}]} {
    %c0 = arith.constant 0 : index
    %c0_0 = arith.constant 0 : index
    %0 = vector.load %arg1[%c0, %c0_0] : memref<256x16xbf16, #tpu.memory_space<vmem>>, vector<256x16xbf16>
    %1 = arith.extf %0 : vector<256x16xbf16> to vector<256x16xf32>
    %c0_1 = arith.constant 0 : index
    %c0_2 = arith.constant 0 : index
    %2 = vector.load %arg2[%c0_1, %c0_2] : memref<1x16xf32, #tpu.memory_space<vmem>>, vector<1x16xf32>
    %3 = vector.broadcast %2 : vector<1x16xf32> to vector<256x16xf32>
    %4 = arith.mulf %1, %3 : vector<256x16xf32>
    %c0_3 = arith.constant 0 : index
    %c0_4 = arith.constant 0 : index
    %5 = vector.load %arg3[%c0_3, %c0_4] : memref<1x16xf32, #tpu.memory_space<vmem>>, vector<1x16xf32>
    %6 = vector.broadcast %5 : vector<1x16xf32> to vector<256x16xf32>
    %7 = arith.addf %4, %6 : vector<256x16xf32>
    %cst = arith.constant 2.000000e-01 : f32
    %8 = vector.broadcast %cst : f32 to vector<256x16xf32>
    %9 = arith.mulf %8, %7 : vector<256x16xf32>
    %10 = arith.maximumf %7, %9 : vector<256x16xf32>
    %11 = arith.truncf %10 : vector<256x16xf32> to vector<256x16xbf16>
    %c0_5 = arith.constant 0 : index
    %c0_6 = arith.constant 0 : index
    %12 = vector.load %arg4[%c0_5, %c0_6] : memref<256x16xbf16, #tpu.memory_space<vmem>>, vector<256x16xbf16>
    tpu.vector_store %arg4[%c0_5, %c0_6], %11 {strides = array<i32>} : memref<256x16xbf16, #tpu.memory_space<vmem>>, vector<256x16xbf16>,
    return
  }
  func.func @transform_0(%arg0: i32) -> (i32, i32) {
    %c0_i32 = arith.constant 0 : i32
    %c0_i32_0 = arith.constant 0 : i32
    return %arg0, %c0_i32 : i32, i32
  }
  func.func @transform_1(%arg0: i32) -> (i32, i32) {
    %c0_i32 = arith.constant 0 : i32
    %c0_i32_0 = arith.constant 0 : i32
    %c0_i32_1 = arith.constant 0 : i32
    return %c0_i32, %c0_i32_0 : i32, i32
  }
  func.func @transform_2(%arg0: i32) -> (i32, i32) {
    %c0_i32 = arith.constant 0 : i32
    %c0_i32_0 = arith.constant 0 : i32
    %c0_i32_1 = arith.constant 0 : i32
    return %c0_i32, %c0_i32_0 : i32, i32
  }
  func.func @transform_3(%arg0: i32) -> (i32, i32) {
    %c0_i32 = arith.constant 0 : i32
    %c0_i32_0 = arith.constant 0 : i32
    return %arg0, %c0_i32 : i32, i32
  }
}

module attributes {stable_mosaic.version = 11 : i64} {
  func.func @_matmul_stats_kernel(%arg0: i32, %arg1: memref<64x256xbf16, #tpu.memory_space<vmem>>, %arg2: memref<256x32xbf16, #tpu.memory_space<vmem>>, %arg3: memref<64x32xbf16, #tpu.memory_space<vmem>>, %arg4: memref<1x1x32xf32, #tpu.memory_space<vmem>>, %arg5: memref<1x1x32xf32, #tpu.memory_space<vmem>>) attributes {dimension_semantics = [#tpu.dimension_semantics<parallel>], iteration_bounds = array<i64: 2>, scalar_prefetch = 0 : i64, scratch_operands = 0 : i64, tpu.core_type = #tpu.core_type<tc>, window_params = [{transform_indices = @transform_0, window_bounds = array<i64: 64, 256>}, {pipeline_mode = #tpu.pipeline_mode<synchronous>, transform_indices = @transform_1, window_bounds = array<i64: 256, 32>}, {transform_indices = @transform_2, window_bounds = array<i64: 64, 32>}, {transform_indices = @transform_3, window_bounds = array<i64: 1, 1, 32>}, {transform_indices = @transform_4, window_bounds = array<i64: 1, 1, 32>}]} {
    %c0 = arith.constant 0 : index
    %c0_0 = arith.constant 0 : index
    %0 = vector.load %arg1[%c0, %c0_0] : memref<64x256xbf16, #tpu.memory_space<vmem>>, vector<64x256xbf16>
    %c0_1 = arith.constant 0 : index
    %c0_2 = arith.constant 0 : index
    %1 = vector.load %arg2[%c0_1, %c0_2] : memref<256x32xbf16, #tpu.memory_space<vmem>>, vector<256x32xbf16>
    %cst = arith.constant dense<0.000000e+00> : vector<64x32xf32>
    %2 = tpu.matmul %0, %1, %cst {dimension_numbers = #tpu.dot_dimension_numbers<[1], [0], [0], [1], [0, 0, 1, 1], [], []>} : vector<64x256xbf16>, vector<256x32xbf16>, vector<64x32xf32> -> vector<64x32xf32>
    %3 = arith.truncf %2 : vector<64x32xf32> to vector<64x32xbf16>
    %c0_3 = arith.constant 0 : index
    %c0_4 = arith.constant 0 : index
    %4 = vector.load %arg3[%c0_3, %c0_4] : memref<64x32xbf16, #tpu.memory_space<vmem>>, vector<64x32xbf16>
    tpu.vector_store %arg3[%c0_3, %c0_4], %3 {strides = array<i32>} : memref<64x32xbf16, #tpu.memory_space<vmem>>, vector<64x32xbf16>,
    %cst_5 = arith.constant dense<0.000000e+00> : vector<32xf32>
    %5 = vector.multi_reduction <add>, %2, %cst_5 [0] : vector<64x32xf32> to vector<32xf32>
    %6 = vector.shape_cast %5 : vector<32xf32> to vector<1x32xf32>
    %7 = vector.shape_cast %6 : vector<1x32xf32> to vector<1x1x32xf32>
    %c0_6 = arith.constant 0 : index
    %c0_7 = arith.constant 0 : index
    %c0_8 = arith.constant 0 : index
    %8 = vector.load %arg4[%c0_6, %c0_7, %c0_8] : memref<1x1x32xf32, #tpu.memory_space<vmem>>, vector<1x1x32xf32>
    tpu.vector_store %arg4[%c0_6, %c0_7, %c0_8], %7 {strides = array<i32>} : memref<1x1x32xf32, #tpu.memory_space<vmem>>, vector<1x1x32xf32>,
    %9 = arith.mulf %2, %2 : vector<64x32xf32>
    %cst_9 = arith.constant dense<0.000000e+00> : vector<32xf32>
    %10 = vector.multi_reduction <add>, %9, %cst_9 [0] : vector<64x32xf32> to vector<32xf32>
    %11 = vector.shape_cast %10 : vector<32xf32> to vector<1x32xf32>
    %12 = vector.shape_cast %11 : vector<1x32xf32> to vector<1x1x32xf32>
    %c0_10 = arith.constant 0 : index
    %c0_11 = arith.constant 0 : index
    %c0_12 = arith.constant 0 : index
    %13 = vector.load %arg5[%c0_10, %c0_11, %c0_12] : memref<1x1x32xf32, #tpu.memory_space<vmem>>, vector<1x1x32xf32>
    tpu.vector_store %arg5[%c0_10, %c0_11, %c0_12], %12 {strides = array<i32>} : memref<1x1x32xf32, #tpu.memory_space<vmem>>, vector<1x1x32xf32>,
    return
  }
  func.func @transform_0(%arg0: i32) -> (i32, i32) {
    %c0_i32 = arith.constant 0 : i32
    %c0_i32_0 = arith.constant 0 : i32
    return %arg0, %c0_i32 : i32, i32
  }
  func.func @transform_1(%arg0: i32) -> (i32, i32) {
    %c0_i32 = arith.constant 0 : i32
    %c0_i32_0 = arith.constant 0 : i32
    %c0_i32_1 = arith.constant 0 : i32
    return %c0_i32, %c0_i32_0 : i32, i32
  }
  func.func @transform_2(%arg0: i32) -> (i32, i32) {
    %c0_i32 = arith.constant 0 : i32
    %c0_i32_0 = arith.constant 0 : i32
    return %arg0, %c0_i32 : i32, i32
  }
  func.func @transform_3(%arg0: i32) -> (i32, i32, i32) {
    %c0_i32 = arith.constant 0 : i32
    %c0_i32_0 = arith.constant 0 : i32
    %c0_i32_1 = arith.constant 0 : i32
    return %arg0, %c0_i32, %c0_i32_0 : i32, i32, i32
  }
  func.func @transform_4(%arg0: i32) -> (i32, i32, i32) {
    %c0_i32 = arith.constant 0 : i32
    %c0_i32_0 = arith.constant 0 : i32
    %c0_i32_1 = arith.constant 0 : i32
    return %arg0, %c0_i32, %c0_i32_0 : i32, i32, i32
  }
}

module attributes {stable_mosaic.version = 11 : i64} {
  func.func @_bn_lrelu_kernel(%arg0: i32, %arg1: memref<64x32xbf16, #tpu.memory_space<vmem>>, %arg2: memref<1x32xf32, #tpu.memory_space<vmem>>, %arg3: memref<1x32xf32, #tpu.memory_space<vmem>>, %arg4: memref<64x32xbf16, #tpu.memory_space<vmem>>) attributes {dimension_semantics = [#tpu.dimension_semantics<parallel>], iteration_bounds = array<i64: 2>, scalar_prefetch = 0 : i64, scratch_operands = 0 : i64, tpu.core_type = #tpu.core_type<tc>, window_params = [{transform_indices = @transform_0, window_bounds = array<i64: 64, 32>}, {pipeline_mode = #tpu.pipeline_mode<synchronous>, transform_indices = @transform_1, window_bounds = array<i64: 1, 32>}, {pipeline_mode = #tpu.pipeline_mode<synchronous>, transform_indices = @transform_2, window_bounds = array<i64: 1, 32>}, {transform_indices = @transform_3, window_bounds = array<i64: 64, 32>}]} {
    %c0 = arith.constant 0 : index
    %c0_0 = arith.constant 0 : index
    %0 = vector.load %arg1[%c0, %c0_0] : memref<64x32xbf16, #tpu.memory_space<vmem>>, vector<64x32xbf16>
    %1 = arith.extf %0 : vector<64x32xbf16> to vector<64x32xf32>
    %c0_1 = arith.constant 0 : index
    %c0_2 = arith.constant 0 : index
    %2 = vector.load %arg2[%c0_1, %c0_2] : memref<1x32xf32, #tpu.memory_space<vmem>>, vector<1x32xf32>
    %3 = vector.broadcast %2 : vector<1x32xf32> to vector<64x32xf32>
    %4 = arith.mulf %1, %3 : vector<64x32xf32>
    %c0_3 = arith.constant 0 : index
    %c0_4 = arith.constant 0 : index
    %5 = vector.load %arg3[%c0_3, %c0_4] : memref<1x32xf32, #tpu.memory_space<vmem>>, vector<1x32xf32>
    %6 = vector.broadcast %5 : vector<1x32xf32> to vector<64x32xf32>
    %7 = arith.addf %4, %6 : vector<64x32xf32>
    %cst = arith.constant 2.000000e-01 : f32
    %8 = vector.broadcast %cst : f32 to vector<64x32xf32>
    %9 = arith.mulf %8, %7 : vector<64x32xf32>
    %10 = arith.maximumf %7, %9 : vector<64x32xf32>
    %11 = arith.truncf %10 : vector<64x32xf32> to vector<64x32xbf16>
    %c0_5 = arith.constant 0 : index
    %c0_6 = arith.constant 0 : index
    %12 = vector.load %arg4[%c0_5, %c0_6] : memref<64x32xbf16, #tpu.memory_space<vmem>>, vector<64x32xbf16>
    tpu.vector_store %arg4[%c0_5, %c0_6], %11 {strides = array<i32>} : memref<64x32xbf16, #tpu.memory_space<vmem>>, vector<64x32xbf16>,
    return
  }
  func.func @transform_0(%arg0: i32) -> (i32, i32) {
    %c0_i32 = arith.constant 0 : i32
    %c0_i32_0 = arith.constant 0 : i32
    return %arg0, %c0_i32 : i32, i32
  }
  func.func @transform_1(%arg0: i32) -> (i32, i32) {
    %c0_i32 = arith.constant 0 : i32
    %c0_i32_0 = arith.constant 0 : i32
    %c0_i32_1 = arith.constant 0 : i32
    return %c0_i32, %c0_i32_0 : i32, i32
  }
  func.func @transform_2(%arg0: i32) -> (i32, i32) {
    %c0_i32 = arith.constant 0 : i32
    %c0_i32_0 = arith.constant 0 : i32
    %c0_i32_1 = arith.constant 0 : i32
    return %c0_i32, %c0_i32_0 : i32, i32
  }
  func.func @transform_3(%arg0: i32) -> (i32, i32) {
    %c0_i32 = arith.constant 0 : i32
    %c0_i32_0 = arith.constant 0 : i32
    return %arg0, %c0_i32 : i32, i32
  }
}

module attributes {stable_mosaic.version = 11 : i64} {
  func.func @_matmul_stats_kernel(%arg0: i32, %arg1: memref<16x512xbf16, #tpu.memory_space<vmem>>, %arg2: memref<512x128xbf16, #tpu.memory_space<vmem>>, %arg3: memref<16x128xbf16, #tpu.memory_space<vmem>>, %arg4: memref<1x1x128xf32, #tpu.memory_space<vmem>>, %arg5: memref<1x1x128xf32, #tpu.memory_space<vmem>>) attributes {dimension_semantics = [#tpu.dimension_semantics<parallel>], iteration_bounds = array<i64: 2>, scalar_prefetch = 0 : i64, scratch_operands = 0 : i64, tpu.core_type = #tpu.core_type<tc>, window_params = [{transform_indices = @transform_0, window_bounds = array<i64: 16, 512>}, {pipeline_mode = #tpu.pipeline_mode<synchronous>, transform_indices = @transform_1, window_bounds = array<i64: 512, 128>}, {transform_indices = @transform_2, window_bounds = array<i64: 16, 128>}, {transform_indices = @transform_3, window_bounds = array<i64: 1, 1, 128>}, {transform_indices = @transform_4, window_bounds = array<i64: 1, 1, 128>}]} {
    %c0 = arith.constant 0 : index
    %c0_0 = arith.constant 0 : index
    %0 = vector.load %arg1[%c0, %c0_0] : memref<16x512xbf16, #tpu.memory_space<vmem>>, vector<16x512xbf16>
    %c0_1 = arith.constant 0 : index
    %c0_2 = arith.constant 0 : index
    %1 = vector.load %arg2[%c0_1, %c0_2] : memref<512x128xbf16, #tpu.memory_space<vmem>>, vector<512x128xbf16>
    %cst = arith.constant dense<0.000000e+00> : vector<16x128xf32>
    %2 = tpu.matmul %0, %1, %cst {dimension_numbers = #tpu.dot_dimension_numbers<[1], [0], [0], [1], [0, 0, 1, 1], [], []>} : vector<16x512xbf16>, vector<512x128xbf16>, vector<16x128xf32> -> vector<16x128xf32>
    %3 = arith.truncf %2 : vector<16x128xf32> to vector<16x128xbf16>
    %c0_3 = arith.constant 0 : index
    %c0_4 = arith.constant 0 : index
    %4 = vector.load %arg3[%c0_3, %c0_4] : memref<16x128xbf16, #tpu.memory_space<vmem>>, vector<16x128xbf16>
    tpu.vector_store %arg3[%c0_3, %c0_4], %3 {strides = array<i32>} : memref<16x128xbf16, #tpu.memory_space<vmem>>, vector<16x128xbf16>,
    %cst_5 = arith.constant dense<0.000000e+00> : vector<128xf32>
    %5 = vector.multi_reduction <add>, %2, %cst_5 [0] : vector<16x128xf32> to vector<128xf32>
    %6 = vector.shape_cast %5 : vector<128xf32> to vector<1x128xf32>
    %7 = vector.shape_cast %6 : vector<1x128xf32> to vector<1x1x128xf32>
    %c0_6 = arith.constant 0 : index
    %c0_7 = arith.constant 0 : index
    %c0_8 = arith.constant 0 : index
    %8 = vector.load %arg4[%c0_6, %c0_7, %c0_8] : memref<1x1x128xf32, #tpu.memory_space<vmem>>, vector<1x1x128xf32>
    tpu.vector_store %arg4[%c0_6, %c0_7, %c0_8], %7 {strides = array<i32>} : memref<1x1x128xf32, #tpu.memory_space<vmem>>, vector<1x1x128xf32>,
    %9 = arith.mulf %2, %2 : vector<16x128xf32>
    %cst_9 = arith.constant dense<0.000000e+00> : vector<128xf32>
    %10 = vector.multi_reduction <add>, %9, %cst_9 [0] : vector<16x128xf32> to vector<128xf32>
    %11 = vector.shape_cast %10 : vector<128xf32> to vector<1x128xf32>
    %12 = vector.shape_cast %11 : vector<1x128xf32> to vector<1x1x128xf32>
    %c0_10 = arith.constant 0 : index
    %c0_11 = arith.constant 0 : index
    %c0_12 = arith.constant 0 : index
    %13 = vector.load %arg5[%c0_10, %c0_11, %c0_12] : memref<1x1x128xf32, #tpu.memory_space<vmem>>, vector<1x1x128xf32>
    tpu.vector_store %arg5[%c0_10, %c0_11, %c0_12], %12 {strides = array<i32>} : memref<1x1x128xf32, #tpu.memory_space<vmem>>, vector<1x1x128xf32>,
    return
  }
  func.func @transform_0(%arg0: i32) -> (i32, i32) {
    %c0_i32 = arith.constant 0 : i32
    %c0_i32_0 = arith.constant 0 : i32
    return %arg0, %c0_i32 : i32, i32
  }
  func.func @transform_1(%arg0: i32) -> (i32, i32) {
    %c0_i32 = arith.constant 0 : i32
    %c0_i32_0 = arith.constant 0 : i32
    %c0_i32_1 = arith.constant 0 : i32
    return %c0_i32, %c0_i32_0 : i32, i32
  }
  func.func @transform_2(%arg0: i32) -> (i32, i32) {
    %c0_i32 = arith.constant 0 : i32
    %c0_i32_0 = arith.constant 0 : i32
    return %arg0, %c0_i32 : i32, i32
  }
  func.func @transform_3(%arg0: i32) -> (i32, i32, i32) {
    %c0_i32 = arith.constant 0 : i32
    %c0_i32_0 = arith.constant 0 : i32
    %c0_i32_1 = arith.constant 0 : i32
    return %arg0, %c0_i32, %c0_i32_0 : i32, i32, i32
  }
  func.func @transform_4(%arg0: i32) -> (i32, i32, i32) {
    %c0_i32 = arith.constant 0 : i32
    %c0_i32_0 = arith.constant 0 : i32
    %c0_i32_1 = arith.constant 0 : i32
    return %arg0, %c0_i32, %c0_i32_0 : i32, i32, i32
  }
}

module attributes {stable_mosaic.version = 11 : i64} {
  func.func @_tail_kernel(%arg0: i32, %arg1: memref<32x128xbf16, #tpu.memory_space<vmem>>, %arg2: memref<1x128xf32, #tpu.memory_space<vmem>>, %arg3: memref<1x128xf32, #tpu.memory_space<vmem>>, %arg4: memref<32x128xf32, #tpu.memory_space<vmem>>, %arg5: memref<2x32xf32, #tpu.memory_space<vmem>>, %arg6: memref<2x1xf32, #tpu.memory_space<vmem>>) attributes {dimension_semantics = [#tpu.dimension_semantics<arbitrary>], iteration_bounds = array<i64: 1>, scalar_prefetch = 0 : i64, scratch_operands = 0 : i64, tpu.core_type = #tpu.core_type<tc>, window_params = [{pipeline_mode = #tpu.pipeline_mode<synchronous>, transform_indices = @transform_0, window_bounds = array<i64: 32, 128>}, {pipeline_mode = #tpu.pipeline_mode<synchronous>, transform_indices = @transform_1, window_bounds = array<i64: 1, 128>}, {pipeline_mode = #tpu.pipeline_mode<synchronous>, transform_indices = @transform_2, window_bounds = array<i64: 1, 128>}, {pipeline_mode = #tpu.pipeline_mode<synchronous>, transform_indices = @transform_3, window_bounds = array<i64: 32, 128>}, {pipeline_mode = #tpu.pipeline_mode<synchronous>, transform_indices = @transform_4, window_bounds = array<i64: 2, 32>}, {pipeline_mode = #tpu.pipeline_mode<synchronous>, transform_indices = @transform_5, window_bounds = array<i64: 2, 1>}]} {
    %c0 = arith.constant 0 : index
    %c0_0 = arith.constant 0 : index
    %0 = vector.load %arg1[%c0, %c0_0] : memref<32x128xbf16, #tpu.memory_space<vmem>>, vector<32x128xbf16>
    %1 = arith.extf %0 : vector<32x128xbf16> to vector<32x128xf32>
    %c0_1 = arith.constant 0 : index
    %c0_2 = arith.constant 0 : index
    %2 = vector.load %arg2[%c0_1, %c0_2] : memref<1x128xf32, #tpu.memory_space<vmem>>, vector<1x128xf32>
    %3 = vector.broadcast %2 : vector<1x128xf32> to vector<32x128xf32>
    %4 = arith.mulf %1, %3 : vector<32x128xf32>
    %c0_3 = arith.constant 0 : index
    %c0_4 = arith.constant 0 : index
    %5 = vector.load %arg3[%c0_3, %c0_4] : memref<1x128xf32, #tpu.memory_space<vmem>>, vector<1x128xf32>
    %6 = vector.broadcast %5 : vector<1x128xf32> to vector<32x128xf32>
    %7 = arith.addf %4, %6 : vector<32x128xf32>
    %cst = arith.constant 2.000000e-01 : f32
    %8 = vector.broadcast %cst : f32 to vector<32x128xf32>
    %9 = arith.mulf %8, %7 : vector<32x128xf32>
    %10 = arith.maximumf %7, %9 : vector<32x128xf32>
    %c0_5 = arith.constant 0 : index
    %c0_6 = arith.constant 0 : index
    %11 = vector.load %arg4[%c0_5, %c0_6] : memref<32x128xf32, #tpu.memory_space<vmem>>, vector<32x128xf32>
    %12 = arith.mulf %10, %11 : vector<32x128xf32>
    %c0_7 = arith.constant 0 : index
    %c0_8 = arith.constant 0 : index
    %13 = vector.load %arg5[%c0_7, %c0_8] : memref<2x32xf32, #tpu.memory_space<vmem>>, vector<2x32xf32>
    %cst_9 = arith.constant dense<0.000000e+00> : vector<2x128xf32>
    %14 = tpu.matmul %13, %12, %cst_9 {dimension_numbers = #tpu.dot_dimension_numbers<[1], [0], [0], [1], [0, 0, 1, 1], [], []>} : vector<2x32xf32>, vector<32x128xf32>, vector<2x128xf32> -> vector<2x128xf32>
    %cst_10 = arith.constant dense<0.000000e+00> : vector<2xf32>
    %15 = vector.multi_reduction <add>, %14, %cst_10 [1] : vector<2x128xf32> to vector<2xf32>
    %16 = vector.shape_cast %15 : vector<2xf32> to vector<2x1xf32>
    %17 = arith.negf %16 : vector<2x1xf32>
    %18 = math.exp %17 : vector<2x1xf32>
    %cst_11 = arith.constant 1.000000e+00 : f32
    %19 = vector.broadcast %cst_11 : f32 to vector<2x1xf32>
    %20 = arith.addf %19, %18 : vector<2x1xf32>
    %21 = arith.divf %19, %20 : vector<2x1xf32>
    %c0_12 = arith.constant 0 : index
    %c0_13 = arith.constant 0 : index
    %22 = vector.load %arg6[%c0_12, %c0_13] : memref<2x1xf32, #tpu.memory_space<vmem>>, vector<2x1xf32>
    tpu.vector_store %arg6[%c0_12, %c0_13], %21 {strides = array<i32>} : memref<2x1xf32, #tpu.memory_space<vmem>>, vector<2x1xf32>,
    return
  }
  func.func @transform_0(%arg0: i32) -> (i32, i32) {
    %c0_i32 = arith.constant 0 : i32
    %c0_i32_0 = arith.constant 0 : i32
    %c0_i32_1 = arith.constant 0 : i32
    return %c0_i32, %c0_i32_0 : i32, i32
  }
  func.func @transform_1(%arg0: i32) -> (i32, i32) {
    %c0_i32 = arith.constant 0 : i32
    %c0_i32_0 = arith.constant 0 : i32
    %c0_i32_1 = arith.constant 0 : i32
    return %c0_i32, %c0_i32_0 : i32, i32
  }
  func.func @transform_2(%arg0: i32) -> (i32, i32) {
    %c0_i32 = arith.constant 0 : i32
    %c0_i32_0 = arith.constant 0 : i32
    %c0_i32_1 = arith.constant 0 : i32
    return %c0_i32, %c0_i32_0 : i32, i32
  }
  func.func @transform_3(%arg0: i32) -> (i32, i32) {
    %c0_i32 = arith.constant 0 : i32
    %c0_i32_0 = arith.constant 0 : i32
    %c0_i32_1 = arith.constant 0 : i32
    return %c0_i32, %c0_i32_0 : i32, i32
  }
  func.func @transform_4(%arg0: i32) -> (i32, i32) {
    %c0_i32 = arith.constant 0 : i32
    %c0_i32_0 = arith.constant 0 : i32
    %c0_i32_1 = arith.constant 0 : i32
    return %c0_i32, %c0_i32_0 : i32, i32
  }
  func.func @transform_5(%arg0: i32) -> (i32, i32) {
    %c0_i32 = arith.constant 0 : i32
    %c0_i32_0 = arith.constant 0 : i32
    %c0_i32_1 = arith.constant 0 : i32
    return %c0_i32, %c0_i32_0 : i32, i32
  }
}

</mosaic_0001>

<bundles_post_ra>
// kernel: discriminator_forward.7
= control target key start
LH: loop header
LB: loop body
LE: loop exit
PB: predicated region body
PF: predicated region fallthrough
CT: control target
= control target key end

     0   :  { %s1670_s9 = smov 0   ;;  %s1899_s0 = inlined_call_operand.vmem [shape: bf16[2048,48], index: 0, kind: input, shape index: {}]   ;;  %s1900_s1 = inlined_call_operand.vmem [shape: bf16[48,8], index: 1, kind: input, shape index: {}]   ;;  %s1901_s2 = inlined_call_operand.vmem [shape: bf16[2048,8], index: 2, kind: output, shape index: {}]  }
   0x1 LB: > { %s1287_s10 = sadd.s32 4294967295, %s1653_s9   ;;  %p1291_p0 = scmp.ge.s32.totalorder %s1653_s9, 1  ;;  %s1653_s9 = sphi %s1670_s9, %s12_s9  }
   0x2   : > { %p113_p1 = scmp.lt.s32.totalorder %s1653_s9, 5 }
   0x4   : > { %p114_p2 = pnand %p1291_p0, %p113_p1 }
   0x5   : > { %s1292_s13 = sshll.u32 (!%p114_p2), %s1287_s10, 6 }
   0x6   : > { %117 = sbr.rel (%p114_p2) target bundleno = 286 (0x11e), region = 28  ;;  %p136_p3 = scmp.lt.s32.totalorder (!%p114_p2), %s1292_s13, 255 }
   0xb   : > { %v1612_v0 = vld [vmem:[%s1900_s1 + $0x10] sm:$0xff]   ;;  %v1613_v1 = vld [vmem:[%s1900_s1 + $0x8] sm:$0xff]   ;;  %s1903_s13 = smov (!%p136_p3, %s1292_s13), 255  ;;  %v1614_v2 = vld [vmem:[%s1900_s1] sm:$0xff]   ;;  %vm396_vm0 = vcmask 392192   ;;  %vm1166_vm1 = vcmask 60416  }
   0xc   : > { %1528 = vmatprep.subr.bf16.mxu0 %v1612_v0  ;;  %1598 = vmatprep.subr.bf16.mxu1 %v1612_v0  ;;  %s1293_s18 = sshll.u32 %s1903_s13, 2 }
   0xd   : > { %1529 = vmatpush3.bf16.msra.mxu0 %v1612_v0  ;;  %1601 = vmatpush3.bf16.msra.mxu1 %v1612_v0  ;;  %s1695_s21 = scalar_lea.vmem %s1899_s0, %s1293_s18  ;;  %s1766_s24 = scalar_lea.vmem %s1901_s2, %s1293_s18 }
   0xe   : > { %1530 = vmatprep.subr.bf16.mxu0 %v1613_v1  ;;  %1599 = vmatprep.subr.bf16.mxu1 %v1613_v1  ;;  %v1615_v3 = vld [vmem:[%s1695_s21] sm:$0xff]   ;;  %v1617_v5 = vld [vmem:[%s1695_s21 + $0x8] sm:$0xff]   ;;  %v1619_v7 = vld [vmem:[%s1695_s21 + $0x10] sm:$0xff]  }
   0xf   : > { %v1616_v4 = vld [vmem:[%s1695_s21 + $0x80] sm:$0xff]   ;;  %1534 = vmatprep.mubr.msk.bf16.mxu0 %vm396_vm0, %v1615_v3  ;;  %v1618_v6 = vld [vmem:[%s1695_s21 + $0x88] sm:$0xff]   ;;  %v1620_v8 = vld [vmem:[%s1695_s21 + $0x90] sm:$0xff]  }
  0x10   : > { %1566 = vmatprep.mubr.msk.bf16.mxu1 %vm396_vm0, %v1616_v4  ;;  %v1621_v9 = vld [vmem:[%s1695_s21 + $0x18] sm:$0xff]   ;;  %v1623_v11 = vld [vmem:[%s1695_s21 + $0x20] sm:$0xff]   ;;  %v1625_v13 = vld [vmem:[%s1695_s21 + $0x28] sm:$0xff]  }
  0x11   : > { %1531 = vmatpush3.bf16.msra.mxu0 %v1613_v1  ;;  %1602 = vmatpush3.bf16.msra.mxu1 %v1613_v1  ;;  %v1622_v10 = vld [vmem:[%s1695_s21 + $0x98] sm:$0xff]   ;;  %v1624_v12 = vld [vmem:[%s1695_s21 + $0xa0] sm:$0xff]   ;;  %v1626_v14 = vld [vmem:[%s1695_s21 + $0xa8] sm:$0xff]  }
  0x12   : > { %1532 = vmatprep.subr.bf16.mxu0 %v1614_v2  ;;  %1600 = vmatprep.subr.bf16.mxu1 %v1614_v2  ;;  %v1627_v15 = vld [vmem:[%s1695_s21 + $0x30] sm:$0xff]   ;;  %v1629_v17 = vld [vmem:[%s1695_s21 + $0x38] sm:$0xff]   ;;  %v1631_v19 = vld [vmem:[%s1695_s21 + $0x40] sm:$0xff]  }
  0x13   : > { %v1628_v16 = vld [vmem:[%s1695_s21 + $0xb0] sm:$0xff]   ;;  %v1630_v18 = vld [vmem:[%s1695_s21 + $0xb8] sm:$0xff]   ;;  %v1632_v20 = vld [vmem:[%s1695_s21 + $0xc0] sm:$0xff]  }
  0x14   : > { %v1633_v21 = vld [vmem:[%s1695_s21 + $0x48] sm:$0xff]   ;;  %v1635_v23 = vld [vmem:[%s1695_s21 + $0x50] sm:$0xff]   ;;  %v1637_v25 = vld [vmem:[%s1695_s21 + $0x58] sm:$0xff]  }
  0x15   : > { %1533 = vmatpush3.bf16.msra.mxu0 %v1614_v2  ;;  %1603 = vmatpush3.bf16.msra.mxu1 %v1614_v2  ;;  %v1634_v22 = vld [vmem:[%s1695_s21 + $0xc8] sm:$0xff]   ;;  %v1636_v24 = vld [vmem:[%s1695_s21 + $0xd0] sm:$0xff]   ;;  %v1638_v26 = vld [vmem:[%s1695_s21 + $0xd8] sm:$0xff]  }
  0x16   : > { %v1639_v27 = vld [vmem:[%s1695_s21 + $0x60] sm:$0xff]   ;;  %v1641_v29 = vld [vmem:[%s1695_s21 + $0x68] sm:$0xff]   ;;  %v1643_v31 = vld [vmem:[%s1695_s21 + $0x70] sm:$0xff]  }
  0x17   : > { %v1640_v28 = vld [vmem:[%s1695_s21 + $0xe0] sm:$0xff]   ;;  %v1642_v30 = vld [vmem:[%s1695_s21 + $0xe8] sm:$0xff]   ;;  %v1644_v32 = vld [vmem:[%s1695_s21 + $0xf0] sm:$0xff]  }
  0x18   : > { %1535 = vmatmul.mubr.msk.bf16.vlgmr.msra.gmra.mxu0 %vm396_vm0, %v1617_v5  ;;  %1567 = vmatmul.mubr.msk.bf16.vlgmr.msra.gmra.mxu1 %vm396_vm0, %v1618_v6  ;;  %v1645_v33 = vld [vmem:[%s1695_s21 + $0x78] sm:$0xff]  }
  0x19   : > { %1538 = vmatprep.mubr.msk.bf16.mxu0 %vm396_vm0, %v1619_v7  ;;  %1570 = vmatprep.mubr.msk.bf16.mxu1 %vm396_vm0, %v1620_v8  ;;  %v1646_v34 = vld [vmem:[%s1695_s21 + $0xf8] sm:$0xff]  }
  0x20   : > { %1539 = vmatmul.mubr.msk.bf16.gmra.mxu0 %vm396_vm0, %v1621_v9  ;;  %1571 = vmatmul.mubr.msk.bf16.gmra.mxu1 %vm396_vm0, %v1622_v10 }
  0x21   : > { %1542 = vmatprep.mubr.msk.bf16.mxu0 %vm396_vm0, %v1623_v11  ;;  %1574 = vmatprep.mubr.msk.bf16.mxu1 %vm396_vm0, %v1624_v12 }
  0x28   : > { %1543 = vmatmul.mubr.msk.bf16.gmra.mxu0 %vm396_vm0, %v1625_v13  ;;  %1575 = vmatmul.mubr.msk.bf16.gmra.mxu1 %vm396_vm0, %v1626_v14 }
  0x29   : > { %1546 = vmatprep.mubr.msk.bf16.mxu0 %vm396_vm0, %v1627_v15  ;;  %1578 = vmatprep.mubr.msk.bf16.mxu1 %vm396_vm0, %v1628_v16 }
  0x30   : > { %1547 = vmatmul.mubr.msk.bf16.gmra.mxu0 %vm396_vm0, %v1629_v17  ;;  %1579 = vmatmul.mubr.msk.bf16.gmra.mxu1 %vm396_vm0, %v1630_v18 }
  0x31   : > { %1550 = vmatprep.mubr.msk.bf16.mxu0 %vm396_vm0, %v1631_v19  ;;  %1582 = vmatprep.mubr.msk.bf16.mxu1 %vm396_vm0, %v1632_v20 }
  0x38   : > { %1551 = vmatmul.mubr.msk.bf16.gmra.mxu0 %vm396_vm0, %v1633_v21  ;;  %1583 = vmatmul.mubr.msk.bf16.gmra.mxu1 %vm396_vm0, %v1634_v22 }
  0x39   : > { %1554 = vmatprep.mubr.msk.bf16.mxu0 %vm396_vm0, %v1635_v23  ;;  %1586 = vmatprep.mubr.msk.bf16.mxu1 %vm396_vm0, %v1636_v24 }
  0x40   : > { %1555 = vmatmul.mubr.msk.bf16.gmra.mxu0 %vm396_vm0, %v1637_v25  ;;  %1587 = vmatmul.mubr.msk.bf16.gmra.mxu1 %vm396_vm0, %v1638_v26 }
  0x41   : > { %1558 = vmatprep.mubr.msk.bf16.mxu0 %vm396_vm0, %v1639_v27  ;;  %1590 = vmatprep.mubr.msk.bf16.mxu1 %vm396_vm0, %v1640_v28 }
  0x48   : > { %1559 = vmatmul.mubr.msk.bf16.gmra.mxu0 %vm396_vm0, %v1641_v29  ;;  %1591 = vmatmul.mubr.msk.bf16.gmra.mxu1 %vm396_vm0, %v1642_v30 }
  0x49   : > { %1562 = vmatprep.mubr.msk.bf16.mxu0 %vm396_vm0, %v1643_v31  ;;  %1594 = vmatprep.mubr.msk.bf16.mxu1 %vm396_vm0, %v1644_v32 }
  0x50   : > { %1563 = vmatmul.mubr.msk.bf16.gmra.mxu0 %vm396_vm0, %v1645_v33  ;;  %1595 = vmatmul.mubr.msk.bf16.gmra.mxu1 %vm396_vm0, %v1646_v34 }
  0xd8   : > { %v1536_v35 = vpop.f32.mrf.mxu0  ;;  %v1568_v36 = vpop.f32.mrf.mxu1 }
  0xd9   : > { %v784_v37 = vmul.f32 0.2, %v1536_v35  ;;  %v816_v38 = vmul.f32 0.2, %v1568_v36 }
  0xda   : > { %v527_v39 = vpop.f32.mrf.mxu0  ;;  %v655_v40 = vpop.f32.mrf.mxu1 }
  0xdb   : > { %v848_v41 = vmax.f32 %v1536_v35, %v784_v37  ;;  %v880_v42 = vmax.f32 %v1568_v36, %v816_v38  ;;  %v782_v43 = vmul.f32 0.2, %v527_v39  ;;  %v814_v44 = vmul.f32 0.2, %v655_v40 }
  0xdc   : > { %v1537_v45 = vpop.f32.mrf.mxu0  ;;  %v1569_v46 = vpop.f32.mrf.mxu1 }
  0xdd   : > { %v1431_v47 = vpack.c.bf16 %v848_v41, %v848_v41  ;;  %v1463_v48 = vpack.c.bf16 %v880_v42, %v880_v42  ;;  %v846_v49 = vmax.f32 %v527_v39, %v782_v43  ;;  %v878_v50 = vmax.f32 %v655_v40, %v814_v44 }
  0xde   : > { %v785_v51 = vmul.f32 0.2, %v1537_v45  ;;  %v817_v52 = vmul.f32 0.2, %v1569_v46  ;;  %v530_v53 = vpop.f32.mrf.mxu0  ;;  %v658_v54 = vpop.f32.mrf.mxu1 }
  0xdf   : > { %1169 = vst.msk [vmem:[%s1766_s24 + $0x8] sm:$0xf] %vm1166_vm1, %v1431_v47  ;;  %1201 = vst.msk [vmem:[%s1766_s24 + $0x88] sm:$0xf] %vm1166_vm1, %v1463_v48  ;;  %v1429_v55 = vpack.c.bf16 %v846_v49, %v846_v49  ;;  %v1461_v56 = vpack.c.bf16 %v878_v50, %v878_v50  ;;  %v783_v57 = vmul.f32 0.2, %v530_v53 }
  0xe0   : > { %v815_v58 = vmul.f32 0.2, %v658_v54  ;;  %v849_v59 = vmax.f32 %v1537_v45, %v785_v51  ;;  %v881_v60 = vmax.f32 %v1569_v46, %v817_v52  ;;  %v1540_v61 = vpop.f32.mrf.mxu0  ;;  %v1572_v62 = vpop.f32.mrf.mxu1 }
  0xe1   : > { %1167 = vst.msk [vmem:[%s1766_s24] sm:$0xf] %vm1166_vm1, %v1429_v55  ;;  %1199 = vst.msk [vmem:[%s1766_s24 + $0x80] sm:$0xf] %vm1166_vm1, %v1461_v56  ;;  %v847_v63 = vmax.f32 %v530_v53, %v783_v57  ;;  %v788_v1 = vmul.f32 0.2, %v1540_v61 }
  0xe2   : > { %v879_v0 = vmax.f32 %v658_v54, %v815_v58  ;;  %v820_v2 = vmul.f32 0.2, %v1572_v62  ;;  %v1432_v3 = vpack.c.bf16 %v849_v59, %v849_v59  ;;  %v1464_v4 = vpack.c.bf16 %v881_v60, %v881_v60  ;;  %v543_v5 = vpop.f32.mrf.mxu0  ;;  %v671_v6 = vpop.f32.mrf.mxu1 }
  0xe3   : > { %v1430_v7 = vpack.c.bf16 %v847_v63, %v847_v63  ;;  %v852_v9 = vmax.f32 %v1540_v61, %v788_v1  ;;  %v786_v11 = vmul.f32 0.2, %v543_v5  ;;  %v818_v12 = vmul.f32 0.2, %v671_v6 }
  0xe4   : > { %v1462_v8 = vpack.c.bf16 %v879_v0, %v879_v0  ;;  %v884_v10 = vmax.f32 %v1572_v62, %v820_v2  ;;  %1170 = vst.msk [vmem:[%s1766_s24 + $0xc] sm:$0xf] %vm1166_vm1, %v1432_v3  ;;  %1202 = vst.msk [vmem:[%s1766_s24 + $0x8c] sm:$0xf] %vm1166_vm1, %v1464_v4  ;;  %v1541_v13 = vpop.f32.mrf.mxu0  ;;  %v1573_v14 = vpop.f32.mrf.mxu1 }
  0xe5   : > { %1168 = vst.msk [vmem:[%s1766_s24 + $0x4] sm:$0xf] %vm1166_vm1, %v1430_v7  ;;  %v1435_v15 = vpack.c.bf16 %v852_v9, %v852_v9  ;;  %v789_v17 = vmul.f32 0.2, %v1541_v13  ;;  %v821_v18 = vmul.f32 0.2, %v1573_v14  ;;  %v850_v19 = vmax.f32 %v543_v5, %v786_v11 }
  0xe6   : > { %1200 = vst.msk [vmem:[%s1766_s24 + $0x84] sm:$0xf] %vm1166_vm1, %v1462_v8  ;;  %v1467_v16 = vpack.c.bf16 %v884_v10, %v884_v10  ;;  %v882_v20 = vmax.f32 %v671_v6, %v818_v12  ;;  %v546_v21 = vpop.f32.mrf.mxu0  ;;  %v674_v22 = vpop.f32.mrf.mxu1 }
  0xe7   : > { %1173 = vst.msk [vmem:[%s1766_s24 + $0x18] sm:$0xf] %vm1166_vm1, %v1435_v15  ;;  %v853_v23 = vmax.f32 %v1541_v13, %v789_v17  ;;  %v885_v24 = vmax.f32 %v1573_v14, %v821_v18  ;;  %v787_v25 = vmul.f32 0.2, %v546_v21  ;;  %v819_v26 = vmul.f32 0.2, %v674_v22 }
  0xe8   : > { %1205 = vst.msk [vmem:[%s1766_s24 + $0x98] sm:$0xf] %vm1166_vm1, %v1467_v16  ;;  %v1433_v27 = vpack.c.bf16 %v850_v19, %v850_v19  ;;  %v1465_v28 = vpack.c.bf16 %v882_v20, %v882_v20  ;;  %v1544_v29 = vpop.f32.mrf.mxu0  ;;  %v1576_v30 = vpop.f32.mrf.mxu1 }
  0xe9   : > { %v1436_v31 = vpack.c.bf16 %v853_v23, %v853_v23  ;;  %v1468_v32 = vpack.c.bf16 %v885_v24, %v885_v24  ;;  %v851_v33 = vmax.f32 %v546_v21, %v787_v25  ;;  %v883_v34 = vmax.f32 %v674_v22, %v819_v26 }
  0xea   : > { %1171 = vst.msk [vmem:[%s1766_s24 + $0x10] sm:$0xf] %vm1166_vm1, %v1433_v27  ;;  %1203 = vst.msk [vmem:[%s1766_s24 + $0x90] sm:$0xf] %vm1166_vm1, %v1465_v28  ;;  %v792_v35 = vmul.f32 0.2, %v1544_v29  ;;  %v559_v37 = vpop.f32.mrf.mxu0  ;;  %v687_v38 = vpop.f32.mrf.mxu1 }
  0xeb   : > { %v824_v36 = vmul.f32 0.2, %v1576_v30  ;;  %1174 = vst.msk [vmem:[%s1766_s24 + $0x1c] sm:$0xf] %vm1166_vm1, %v1436_v31  ;;  %1206 = vst.msk [vmem:[%s1766_s24 + $0x9c] sm:$0xf] %vm1166_vm1, %v1468_v32  ;;  %v1434_v39 = vpack.c.bf16 %v851_v33, %v851_v33  ;;  %v1466_v40 = vpack.c.bf16 %v883_v34, %v883_v34 }
  0xec   : > { %v790_v41 = vmul.f32 0.2, %v559_v37  ;;  %v822_v42 = vmul.f32 0.2, %v687_v38  ;;  %v856_v43 = vmax.f32 %v1544_v29, %v792_v35  ;;  %v1545_v45 = vpop.f32.mrf.mxu0  ;;  %v1577_v46 = vpop.f32.mrf.mxu1 }
  0xed   : > { %v888_v44 = vmax.f32 %v1576_v30, %v824_v36  ;;  %1172 = vst.msk [vmem:[%s1766_s24 + $0x14] sm:$0xf] %vm1166_vm1, %v1434_v39  ;;  %1204 = vst.msk [vmem:[%s1766_s24 + $0x94] sm:$0xf] %vm1166_vm1, %v1466_v40  ;;  %v793_v49 = vmul.f32 0.2, %v1545_v45 }
  0xee   : > { %v854_v47 = vmax.f32 %v559_v37, %v790_v41  ;;  %v886_v48 = vmax.f32 %v687_v38, %v822_v42  ;;  %v825_v50 = vmul.f32 0.2, %v1577_v46  ;;  %v1439_v51 = vpack.c.bf16 %v856_v43, %v856_v43  ;;  %v562_v53 = vpop.f32.mrf.mxu0  ;;  %v690_v54 = vpop.f32.mrf.mxu1 }
  0xef   : > { %v1471_v52 = vpack.c.bf16 %v888_v44, %v888_v44  ;;  %v857_v57 = vmax.f32 %v1545_v45, %v793_v49  ;;  %v791_v59 = vmul.f32 0.2, %v562_v53  ;;  %v823_v60 = vmul.f32 0.2, %v690_v54 }
  0xf0   : > { %v1437_v55 = vpack.c.bf16 %v854_v47, %v854_v47  ;;  %v1469_v56 = vpack.c.bf16 %v886_v48, %v886_v48  ;;  %v889_v58 = vmax.f32 %v1577_v46, %v825_v50  ;;  %1177 = vst.msk [vmem:[%s1766_s24 + $0x28] sm:$0xf] %vm1166_vm1, %v1439_v51  ;;  %v1548_v61 = vpop.f32.mrf.mxu0  ;;  %v1580_v62 = vpop.f32.mrf.mxu1 }
  0xf1   : > { %1209 = vst.msk [vmem:[%s1766_s24 + $0xa8] sm:$0xf] %vm1166_vm1, %v1471_v52  ;;  %v1440_v63 = vpack.c.bf16 %v857_v57, %v857_v57  ;;  %v796_v1 = vmul.f32 0.2, %v1548_v61  ;;  %v828_v2 = vmul.f32 0.2, %v1580_v62  ;;  %v855_v3 = vmax.f32 %v562_v53, %v791_v59 }
  0xf2   : > { %1175 = vst.msk [vmem:[%s1766_s24 + $0x20] sm:$0xf] %vm1166_vm1, %v1437_v55  ;;  %1207 = vst.msk [vmem:[%s1766_s24 + $0xa0] sm:$0xf] %vm1166_vm1, %v1469_v56  ;;  %v1472_v0 = vpack.c.bf16 %v889_v58, %v889_v58  ;;  %v887_v4 = vmax.f32 %v690_v54, %v823_v60  ;;  %v575_v5 = vpop.f32.mrf.mxu0  ;;  %v703_v6 = vpop.f32.mrf.mxu1 }
  0xf3   : > { %1178 = vst.msk [vmem:[%s1766_s24 + $0x2c] sm:$0xf] %vm1166_vm1, %v1440_v63  ;;  %v860_v7 = vmax.f32 %v1548_v61, %v796_v1  ;;  %v892_v8 = vmax.f32 %v1580_v62, %v828_v2  ;;  %v794_v9 = vmul.f32 0.2, %v575_v5  ;;  %v826_v10 = vmul.f32 0.2, %v703_v6 }
  0xf4   : > { %1210 = vst.msk [vmem:[%s1766_s24 + $0xac] sm:$0xf] %vm1166_vm1, %v1472_v0  ;;  %v1438_v11 = vpack.c.bf16 %v855_v3, %v855_v3  ;;  %v1470_v12 = vpack.c.bf16 %v887_v4, %v887_v4  ;;  %v1549_v13 = vpop.f32.mrf.mxu0  ;;  %v1581_v14 = vpop.f32.mrf.mxu1 }
  0xf5   : > { %v1443_v15 = vpack.c.bf16 %v860_v7, %v860_v7  ;;  %v1475_v16 = vpack.c.bf16 %v892_v8, %v892_v8  ;;  %v858_v17 = vmax.f32 %v575_v5, %v794_v9  ;;  %v890_v18 = vmax.f32 %v703_v6, %v826_v10 }
  0xf6   : > { %1176 = vst.msk [vmem:[%s1766_s24 + $0x24] sm:$0xf] %vm1166_vm1, %v1438_v11  ;;  %1208 = vst.msk [vmem:[%s1766_s24 + $0xa4] sm:$0xf] %vm1166_vm1, %v1470_v12  ;;  %v797_v19 = vmul.f32 0.2, %v1549_v13  ;;  %v578_v21 = vpop.f32.mrf.mxu0  ;;  %v706_v22 = vpop.f32.mrf.mxu1 }
  0xf7   : > { %v829_v20 = vmul.f32 0.2, %v1581_v14  ;;  %1181 = vst.msk [vmem:[%s1766_s24 + $0x38] sm:$0xf] %vm1166_vm1, %v1443_v15  ;;  %1213 = vst.msk [vmem:[%s1766_s24 + $0xb8] sm:$0xf] %vm1166_vm1, %v1475_v16  ;;  %v1441_v23 = vpack.c.bf16 %v858_v17, %v858_v17  ;;  %v1473_v24 = vpack.c.bf16 %v890_v18, %v890_v18 }
  0xf8   : > { %v795_v25 = vmul.f32 0.2, %v578_v21  ;;  %v827_v26 = vmul.f32 0.2, %v706_v22  ;;  %v861_v27 = vmax.f32 %v1549_v13, %v797_v19  ;;  %v1552_v29 = vpop.f32.mrf.mxu0  ;;  %v1584_v30 = vpop.f32.mrf.mxu1 }
  0xf9   : > { %v893_v28 = vmax.f32 %v1581_v14, %v829_v20  ;;  %1179 = vst.msk [vmem:[%s1766_s24 + $0x30] sm:$0xf] %vm1166_vm1, %v1441_v23  ;;  %1211 = vst.msk [vmem:[%s1766_s24 + $0xb0] sm:$0xf] %vm1166_vm1, %v1473_v24  ;;  %v800_v33 = vmul.f32 0.2, %v1552_v29 }
  0xfa   : > { %v859_v31 = vmax.f32 %v578_v21, %v795_v25  ;;  %v891_v32 = vmax.f32 %v706_v22, %v827_v26  ;;  %v832_v34 = vmul.f32 0.2, %v1584_v30  ;;  %v1444_v35 = vpack.c.bf16 %v861_v27, %v861_v27  ;;  %v591_v37 = vpop.f32.mrf.mxu0  ;;  %v719_v38 = vpop.f32.mrf.mxu1 }
  0xfb   : > { %v1476_v36 = vpack.c.bf16 %v893_v28, %v893_v28  ;;  %v864_v41 = vmax.f32 %v1552_v29, %v800_v33  ;;  %v798_v43 = vmul.f32 0.2, %v591_v37  ;;  %v830_v44 = vmul.f32 0.2, %v719_v38 }
  0xfc   : > { %v1442_v39 = vpack.c.bf16 %v859_v31, %v859_v31  ;;  %v1474_v40 = vpack.c.bf16 %v891_v32, %v891_v32  ;;  %v896_v42 = vmax.f32 %v1584_v30, %v832_v34  ;;  %1182 = vst.msk [vmem:[%s1766_s24 + $0x3c] sm:$0xf] %vm1166_vm1, %v1444_v35  ;;  %v1553_v45 = vpop.f32.mrf.mxu0  ;;  %v1585_v46 = vpop.f32.mrf.mxu1 }
  0xfd   : > { %1214 = vst.msk [vmem:[%s1766_s24 + $0xbc] sm:$0xf] %vm1166_vm1, %v1476_v36  ;;  %v1447_v47 = vpack.c.bf16 %v864_v41, %v864_v41  ;;  %v801_v49 = vmul.f32 0.2, %v1553_v45  ;;  %v833_v50 = vmul.f32 0.2, %v1585_v46  ;;  %v862_v51 = vmax.f32 %v591_v37, %v798_v43 }
  0xfe   : > { %1180 = vst.msk [vmem:[%s1766_s24 + $0x34] sm:$0xf] %vm1166_vm1, %v1442_v39  ;;  %1212 = vst.msk [vmem:[%s1766_s24 + $0xb4] sm:$0xf] %vm1166_vm1, %v1474_v40  ;;  %v1479_v48 = vpack.c.bf16 %v896_v42, %v896_v42  ;;  %v894_v52 = vmax.f32 %v719_v38, %v830_v44  ;;  %v594_v53 = vpop.f32.mrf.mxu0  ;;  %v722_v54 = vpop.f32.mrf.mxu1 }
  0xff   : > { %1185 = vst.msk [vmem:[%s1766_s24 + $0x48] sm:$0xf] %vm1166_vm1, %v1447_v47  ;;  %v865_v55 = vmax.f32 %v1553_v45, %v801_v49  ;;  %v897_v56 = vmax.f32 %v1585_v46, %v833_v50  ;;  %v799_v57 = vmul.f32 0.2, %v594_v53  ;;  %v831_v58 = vmul.f32 0.2, %v722_v54 }
 0x100   : > { %1217 = vst.msk [vmem:[%s1766_s24 + $0xc8] sm:$0xf] %vm1166_vm1, %v1479_v48  ;;  %v1445_v59 = vpack.c.bf16 %v862_v51, %v862_v51  ;;  %v1477_v60 = vpack.c.bf16 %v894_v52, %v894_v52  ;;  %v1556_v61 = vpop.f32.mrf.mxu0  ;;  %v1588_v62 = vpop.f32.mrf.mxu1 }
 0x101   : > { %v1448_v63 = vpack.c.bf16 %v865_v55, %v865_v55  ;;  %v1480_v0 = vpack.c.bf16 %v897_v56, %v897_v56  ;;  %v863_v1 = vmax.f32 %v594_v53, %v799_v57  ;;  %v895_v2 = vmax.f32 %v722_v54, %v831_v58 }
 0x102   : > { %1183 = vst.msk [vmem:[%s1766_s24 + $0x40] sm:$0xf] %vm1166_vm1, %v1445_v59  ;;  %1215 = vst.msk [vmem:[%s1766_s24 + $0xc0] sm:$0xf] %vm1166_vm1, %v1477_v60  ;;  %v804_v3 = vmul.f32 0.2, %v1556_v61  ;;  %v607_v5 = vpop.f32.mrf.mxu0  ;;  %v735_v6 = vpop.f32.mrf.mxu1 }
 0x103   : > { %v836_v4 = vmul.f32 0.2, %v1588_v62  ;;  %1186 = vst.msk [vmem:[%s1766_s24 + $0x4c] sm:$0xf] %vm1166_vm1, %v1448_v63  ;;  %1218 = vst.msk [vmem:[%s1766_s24 + $0xcc] sm:$0xf] %vm1166_vm1, %v1480_v0  ;;  %v1446_v7 = vpack.c.bf16 %v863_v1, %v863_v1  ;;  %v1478_v8 = vpack.c.bf16 %v895_v2, %v895_v2 }
 0x104   : > { %v802_v9 = vmul.f32 0.2, %v607_v5  ;;  %v834_v10 = vmul.f32 0.2, %v735_v6  ;;  %v868_v11 = vmax.f32 %v1556_v61, %v804_v3  ;;  %v1557_v13 = vpop.f32.mrf.mxu0  ;;  %v1589_v14 = vpop.f32.mrf.mxu1 }
 0x105   : > { %v900_v12 = vmax.f32 %v1588_v62, %v836_v4  ;;  %1184 = vst.msk [vmem:[%s1766_s24 + $0x44] sm:$0xf] %vm1166_vm1, %v1446_v7  ;;  %1216 = vst.msk [vmem:[%s1766_s24 + $0xc4] sm:$0xf] %vm1166_vm1, %v1478_v8  ;;  %v805_v17 = vmul.f32 0.2, %v1557_v13 }
 0x106   : > { %v866_v15 = vmax.f32 %v607_v5, %v802_v9  ;;  %v898_v16 = vmax.f32 %v735_v6, %v834_v10  ;;  %v837_v18 = vmul.f32 0.2, %v1589_v14  ;;  %v1451_v19 = vpack.c.bf16 %v868_v11, %v868_v11  ;;  %v610_v21 = vpop.f32.mrf.mxu0  ;;  %v738_v22 = vpop.f32.mrf.mxu1 }
 0x107   : > { %v1483_v20 = vpack.c.bf16 %v900_v12, %v900_v12  ;;  %v869_v25 = vmax.f32 %v1557_v13, %v805_v17  ;;  %v803_v27 = vmul.f32 0.2, %v610_v21  ;;  %v835_v28 = vmul.f32 0.2, %v738_v22 }
 0x108   : > { %v1449_v23 = vpack.c.bf16 %v866_v15, %v866_v15  ;;  %v1481_v24 = vpack.c.bf16 %v898_v16, %v898_v16  ;;  %v901_v26 = vmax.f32 %v1589_v14, %v837_v18  ;;  %1189 = vst.msk [vmem:[%s1766_s24 + $0x58] sm:$0xf] %vm1166_vm1, %v1451_v19  ;;  %v1560_v29 = vpop.f32.mrf.mxu0  ;;  %v1592_v30 = vpop.f32.mrf.mxu1 }
 0x109   : > { %1221 = vst.msk [vmem:[%s1766_s24 + $0xd8] sm:$0xf] %vm1166_vm1, %v1483_v20  ;;  %v1452_v31 = vpack.c.bf16 %v869_v25, %v869_v25  ;;  %v808_v33 = vmul.f32 0.2, %v1560_v29  ;;  %v840_v34 = vmul.f32 0.2, %v1592_v30  ;;  %v867_v35 = vmax.f32 %v610_v21, %v803_v27 }
 0x10a   : > { %1187 = vst.msk [vmem:[%s1766_s24 + $0x50] sm:$0xf] %vm1166_vm1, %v1449_v23  ;;  %1219 = vst.msk [vmem:[%s1766_s24 + $0xd0] sm:$0xf] %vm1166_vm1, %v1481_v24  ;;  %v1484_v32 = vpack.c.bf16 %v901_v26, %v901_v26  ;;  %v899_v36 = vmax.f32 %v738_v22, %v835_v28  ;;  %v623_v37 = vpop.f32.mrf.mxu0  ;;  %v751_v38 = vpop.f32.mrf.mxu1 }
 0x10b   : > { %1190 = vst.msk [vmem:[%s1766_s24 + $0x5c] sm:$0xf] %vm1166_vm1, %v1452_v31  ;;  %v872_v39 = vmax.f32 %v1560_v29, %v808_v33  ;;  %v904_v40 = vmax.f32 %v1592_v30, %v840_v34  ;;  %v806_v41 = vmul.f32 0.2, %v623_v37  ;;  %v838_v42 = vmul.f32 0.2, %v751_v38 }
 0x10c   : > { %1222 = vst.msk [vmem:[%s1766_s24 + $0xdc] sm:$0xf] %vm1166_vm1, %v1484_v32  ;;  %v1450_v43 = vpack.c.bf16 %v867_v35, %v867_v35  ;;  %v1482_v44 = vpack.c.bf16 %v899_v36, %v899_v36  ;;  %v1561_v45 = vpop.f32.mrf.mxu0  ;;  %v1593_v46 = vpop.f32.mrf.mxu1 }
 0x10d   : > { %v1455_v47 = vpack.c.bf16 %v872_v39, %v872_v39  ;;  %v1487_v48 = vpack.c.bf16 %v904_v40, %v904_v40  ;;  %v870_v49 = vmax.f32 %v623_v37, %v806_v41  ;;  %v902_v50 = vmax.f32 %v751_v38, %v838_v42 }
 0x10e   : > { %1188 = vst.msk [vmem:[%s1766_s24 + $0x54] sm:$0xf] %vm1166_vm1, %v1450_v43  ;;  %1220 = vst.msk [vmem:[%s1766_s24 + $0xd4] sm:$0xf] %vm1166_vm1, %v1482_v44  ;;  %v809_v51 = vmul.f32 0.2, %v1561_v45  ;;  %v626_v53 = vpop.f32.mrf.mxu0  ;;  %v754_v54 = vpop.f32.mrf.mxu1 }
 0x10f   : > { %v841_v52 = vmul.f32 0.2, %v1593_v46  ;;  %1193 = vst.msk [vmem:[%s1766_s24 + $0x68] sm:$0xf] %vm1166_vm1, %v1455_v47  ;;  %1225 = vst.msk [vmem:[%s1766_s24 + $0xe8] sm:$0xf] %vm1166_vm1, %v1487_v48  ;;  %v1453_v55 = vpack.c.bf16 %v870_v49, %v870_v49  ;;  %v1485_v56 = vpack.c.bf16 %v902_v50, %v902_v50 }
 0x110   : > { %v807_v57 = vmul.f32 0.2, %v626_v53  ;;  %v839_v58 = vmul.f32 0.2, %v754_v54  ;;  %v873_v59 = vmax.f32 %v1561_v45, %v809_v51  ;;  %v1564_v61 = vpop.f32.mrf.mxu0  ;;  %v1596_v62 = vpop.f32.mrf.mxu1 }
 0x111   : > { %v905_v60 = vmax.f32 %v1593_v46, %v841_v52  ;;  %1191 = vst.msk [vmem:[%s1766_s24 + $0x60] sm:$0xf] %vm1166_vm1, %v1453_v55  ;;  %1223 = vst.msk [vmem:[%s1766_s24 + $0xe0] sm:$0xf] %vm1166_vm1, %v1485_v56  ;;  %v812_v1 = vmul.f32 0.2, %v1564_v61 }
 0x112   : > { %v871_v63 = vmax.f32 %v626_v53, %v807_v57  ;;  %v903_v0 = vmax.f32 %v754_v54, %v839_v58  ;;  %v844_v2 = vmul.f32 0.2, %v1596_v62  ;;  %v1456_v3 = vpack.c.bf16 %v873_v59, %v873_v59  ;;  %v639_v5 = vpop.f32.mrf.mxu0  ;;  %v767_v6 = vpop.f32.mrf.mxu1 }
 0x113   : > { %v1488_v4 = vpack.c.bf16 %v905_v60, %v905_v60  ;;  %v876_v9 = vmax.f32 %v1564_v61, %v812_v1  ;;  %v810_v11 = vmul.f32 0.2, %v639_v5  ;;  %v842_v12 = vmul.f32 0.2, %v767_v6 }
 0x114   : > { %v1454_v7 = vpack.c.bf16 %v871_v63, %v871_v63  ;;  %v1486_v8 = vpack.c.bf16 %v903_v0, %v903_v0  ;;  %v908_v10 = vmax.f32 %v1596_v62, %v844_v2  ;;  %1194 = vst.msk [vmem:[%s1766_s24 + $0x6c] sm:$0xf] %vm1166_vm1, %v1456_v3  ;;  %v1565_v13 = vpop.f32.mrf.mxu0  ;;  %v1597_v14 = vpop.f32.mrf.mxu1 }
 0x115   : > { %1226 = vst.msk [vmem:[%s1766_s24 + $0xec] sm:$0xf] %vm1166_vm1, %v1488_v4  ;;  %v1459_v15 = vpack.c.bf16 %v876_v9, %v876_v9  ;;  %v813_v17 = vmul.f32 0.2, %v1565_v13  ;;  %v845_v18 = vmul.f32 0.2, %v1597_v14  ;;  %v874_v19 = vmax.f32 %v639_v5, %v810_v11 }
 0x116   : > { %1192 = vst.msk [vmem:[%s1766_s24 + $0x64] sm:$0xf] %vm1166_vm1, %v1454_v7  ;;  %1224 = vst.msk [vmem:[%s1766_s24 + $0xe4] sm:$0xf] %vm1166_vm1, %v1486_v8  ;;  %v1491_v16 = vpack.c.bf16 %v908_v10, %v908_v10  ;;  %v906_v20 = vmax.f32 %v767_v6, %v842_v12  ;;  %v642_v21 = vpop.f32.mrf.mxu0  ;;  %v770_v22 = vpop.f32.mrf.mxu1 }
 0x117   : > { %1197 = vst.msk [vmem:[%s1766_s24 + $0x78] sm:$0xf] %vm1166_vm1, %v1459_v15  ;;  %v877_v23 = vmax.f32 %v1565_v13, %v813_v17  ;;  %v909_v24 = vmax.f32 %v1597_v14, %v845_v18  ;;  %v811_v25 = vmul.f32 0.2, %v642_v21  ;;  %v843_v26 = vmul.f32 0.2, %v770_v22 }
 0x118   : > { %1229 = vst.msk [vmem:[%s1766_s24 + $0xf8] sm:$0xf] %vm1166_vm1, %v1491_v16  ;;  %v1457_v27 = vpack.c.bf16 %v874_v19, %v874_v19  ;;  %v1489_v28 = vpack.c.bf16 %v906_v20, %v906_v20 }
 0x119   : > { %v1460_v29 = vpack.c.bf16 %v877_v23, %v877_v23  ;;  %v1492_v30 = vpack.c.bf16 %v909_v24, %v909_v24  ;;  %v875_v31 = vmax.f32 %v642_v21, %v811_v25  ;;  %v907_v32 = vmax.f32 %v770_v22, %v843_v26 }
 0x11a   : > { %1195 = vst.msk [vmem:[%s1766_s24 + $0x70] sm:$0xf] %vm1166_vm1, %v1457_v27  ;;  %1227 = vst.msk [vmem:[%s1766_s24 + $0xf0] sm:$0xf] %vm1166_vm1, %v1489_v28 }
 0x11b   : > { %1198 = vst.msk [vmem:[%s1766_s24 + $0x7c] sm:$0xf] %vm1166_vm1, %v1460_v29  ;;  %1230 = vst.msk [vmem:[%s1766_s24 + $0xfc] sm:$0xf] %vm1166_vm1, %v1492_v30  ;;  %v1458_v33 = vpack.c.bf16 %v875_v31, %v875_v31  ;;  %v1490_v34 = vpack.c.bf16 %v907_v32, %v907_v32 }
 0x11d   : > { %1196 = vst.msk [vmem:[%s1766_s24 + $0x74] sm:$0xf] %vm1166_vm1, %v1458_v33  ;;  %1228 = vst.msk [vmem:[%s1766_s24 + $0xf4] sm:$0xf] %vm1166_vm1, %v1490_v34 }
 0x11e PF: > { %s12_s9 = sadd.s32 1, %s1653_s9  }
 0x11f   : > { %p9_p4 = scmp.ge.s32.totalorder %s12_s9, 6  }
 0x121   :  { %11 = sbr.rel (!%p9_p4) target bundleno = 1 (0x1), region = 58 }

// kernel: discriminator_forward.8
= control target key start
LH: loop header
LB: loop body
LE: loop exit
PB: predicated region body
PF: predicated region fallthrough
CT: control target
= control target key end

     0   :  { %s1265_s15 = smov 0   ;;  %s1584_s0 = inlined_call_operand.vmem [shape: bf16[512,128], index: 0, kind: input, shape index: {}]   ;;  %s1585_s1 = inlined_call_operand.vmem [shape: bf16[128,16], index: 1, kind: input, shape index: {}]   ;;  %s1586_s2 = inlined_call_operand.vmem [shape: bf16[512,16], index: 2, kind: output, shape index: {0}]   ;;  %s1587_s3 = inlined_call_operand.vmem [shape: f32[2,1,16], index: 3, kind: output, shape index: {1}]   ;;  %s1588_s4 = inlined_call_operand.vmem [shape: f32[2,1,16], index: 4, kind: output, shape index: {2}]  }
   0x1 LB: > { %s1271_s16 = sadd.s32 4294967295, %s1238_s15   ;;  %p1017_p0 = scmp.ge.s32.totalorder %s1238_s15, 1  ;;  %s1238_s15 = sphi %s1265_s15, %s15_s15  }
   0x2   : > { %p168_p1 = scmp.lt.s32.totalorder %s1238_s15, 3 }
   0x4   : > { %p169_p2 = pnand %p1017_p0, %p168_p1 }
   0x5   : > { %s1018_s19 = sshll.u32 (!%p169_p2), %s1271_s16, 5  ;;  %p212_p4 = scmp.lt.s32.totalorder (!%p169_p2), %s1271_s16, 1 }
   0x6   : > { %172 = sbr.rel (%p169_p2) target bundleno = 321 (0x141), region = 28  ;;  %p201_p3 = scmp.lt.s32.totalorder (!%p169_p2), %s1018_s19, 63 }
   0xb   : > { %v1208_v0 = vld [vmem:[%s1585_s1 + $0x38] sm:$0xff]   ;;  %v1209_v1 = vld [vmem:[%s1585_s1 + $0x30] sm:$0xff]   ;;  %s1590_s19 = smov (!%p201_p3, %s1018_s19), 63  ;;  %v1210_v2 = vld [vmem:[%s1585_s1 + $0x28] sm:$0xff]   ;;  %vm700_vm0 = vcmask 125952   ;;  %vm733_vm1 = vcmask 130048  }
   0xc   : > { %1136 = vmatprep.subr.bf16.mxu0 %v1208_v0  ;;  %1184 = vmatprep.subr.bf16.mxu1 %v1208_v0  ;;  %s1019_s24 = sshll.u32 %s1590_s19, 2  ;;  %v1211_v3 = vld [vmem:[%s1585_s1 + $0x20] sm:$0xff]   ;;  %v1212_v5 = vld [vmem:[%s1585_s1 + $0x18] sm:$0xff]   ;;  %v1213_v6 = vld [vmem:[%s1585_s1 + $0x10] sm:$0xff]   ;;  %s1592_s16 = smov (!%p212_p4, %s1271_s16), 1  ;;  %vm803_vm2 = vcmask 122880  }
   0xd   : > { %1137 = vmatpush3.bf16.msra.mxu0 %v1208_v0  ;;  %1192 = vmatpush3.bf16.msra.mxu1 %v1208_v0  ;;  %s1293_s27 = scalar_lea.vmem %s1584_s0, %s1019_s24  ;;  %v1214_v8 = vld [vmem:[%s1585_s1 + $0x8] sm:$0xff]   ;;  %v1215_v9 = vld [vmem:[%s1585_s1] sm:$0xff]   ;;  %s1331_s14 = scalar_lea.vmem %s1586_s2, %s1019_s24 }
   0xe   : > { %1138 = vmatprep.subr.bf16.mxu0 %v1209_v1  ;;  %1185 = vmatprep.subr.bf16.mxu1 %v1209_v1  ;;  %v1216_v4 = vld [vmem:[%s1293_s27] sm:$0xff]   ;;  %v1217_v10 = vld [vmem:[%s1293_s27 + $0x8] sm:$0xff]   ;;  %v1218_v12 = vld [vmem:[%s1293_s27 + $0x10] sm:$0xff]   ;;  %s214_s19 = scalar_lea.vmem %s1587_s3, %s1592_s16  ;;  %s217_s22 = scalar_lea.vmem %s1588_s4, %s1592_s16 }
   0xf   : > { %1152 = vmatprep.mubr.bf16.mxu0 %v1216_v4  ;;  %v1224_v7 = vld [vmem:[%s1293_s27 + $0x40] sm:$0xff]   ;;  %v1225_v11 = vld [vmem:[%s1293_s27 + $0x48] sm:$0xff]   ;;  %v1226_v13 = vld [vmem:[%s1293_s27 + $0x50] sm:$0xff]  }
  0x10   : > { %1168 = vmatprep.mubr.bf16.mxu1 %v1224_v7  ;;  %v1219_v14 = vld [vmem:[%s1293_s27 + $0x18] sm:$0xff]   ;;  %v1220_v16 = vld [vmem:[%s1293_s27 + $0x20] sm:$0xff]   ;;  %v1221_v18 = vld [vmem:[%s1293_s27 + $0x28] sm:$0xff]  }
  0x11   : > { %1139 = vmatpush3.bf16.msra.mxu0 %v1209_v1  ;;  %1193 = vmatpush3.bf16.msra.mxu1 %v1209_v1  ;;  %v1227_v15 = vld [vmem:[%s1293_s27 + $0x58] sm:$0xff]   ;;  %v1228_v17 = vld [vmem:[%s1293_s27 + $0x60] sm:$0xff]   ;;  %v1229_v19 = vld [vmem:[%s1293_s27 + $0x68] sm:$0xff]  }
  0x12   : > { %1140 = vmatprep.subr.bf16.mxu0 %v1210_v2  ;;  %1186 = vmatprep.subr.bf16.mxu1 %v1210_v2  ;;  %v1222_v20 = vld [vmem:[%s1293_s27 + $0x30] sm:$0xff]   ;;  %v1223_v22 = vld [vmem:[%s1293_s27 + $0x38] sm:$0xff]  }
  0x13   : > { %v1230_v21 = vld [vmem:[%s1293_s27 + $0x70] sm:$0xff]   ;;  %v1231_v23 = vld [vmem:[%s1293_s27 + $0x78] sm:$0xff]  }
  0x15   : > { %1141 = vmatpush3.bf16.msra.mxu0 %v1210_v2  ;;  %1194 = vmatpush3.bf16.msra.mxu1 %v1210_v2 }
  0x16   : > { %1142 = vmatprep.subr.bf16.mxu0 %v1211_v3  ;;  %1187 = vmatprep.subr.bf16.mxu1 %v1211_v3 }
  0x19   : > { %1143 = vmatpush3.bf16.msra.mxu0 %v1211_v3  ;;  %1195 = vmatpush3.bf16.msra.mxu1 %v1211_v3 }
  0x1a   : > { %1144 = vmatprep.subr.bf16.mxu0 %v1212_v5  ;;  %1188 = vmatprep.subr.bf16.mxu1 %v1212_v5 }
  0x1d   : > { %1145 = vmatpush3.bf16.msra.mxu0 %v1212_v5  ;;  %1196 = vmatpush3.bf16.msra.mxu1 %v1212_v5 }
  0x1e   : > { %1146 = vmatprep.subr.bf16.mxu0 %v1213_v6  ;;  %1189 = vmatprep.subr.bf16.mxu1 %v1213_v6 }
  0x21   : > { %1147 = vmatpush3.bf16.msra.mxu0 %v1213_v6  ;;  %1197 = vmatpush3.bf16.msra.mxu1 %v1213_v6 }
  0x22   : > { %1148 = vmatprep.subr.bf16.mxu0 %v1214_v8  ;;  %1190 = vmatprep.subr.bf16.mxu1 %v1214_v8 }
  0x25   : > { %1149 = vmatpush3.bf16.msra.mxu0 %v1214_v8  ;;  %1198 = vmatpush3.bf16.msra.mxu1 %v1214_v8 }
  0x26   : > { %1150 = vmatprep.subr.bf16.mxu0 %v1215_v9  ;;  %1191 = vmatprep.subr.bf16.mxu1 %v1215_v9 }
  0x29   : > { %1151 = vmatpush3.bf16.msra.mxu0 %v1215_v9  ;;  %1199 = vmatpush3.bf16.msra.mxu1 %v1215_v9 }
  0x2c   : > { %1153 = vmatmul.mubr.bf16.vlgmr.msra.gmra.mxu0 %v1217_v10  ;;  %1169 = vmatmul.mubr.bf16.vlgmr.msra.gmra.mxu1 %v1225_v11 }
  0x2d   : > { %1156 = vmatprep.mubr.bf16.mxu0 %v1218_v12  ;;  %1172 = vmatprep.mubr.bf16.mxu1 %v1226_v13 }
  0x34   : > { %1157 = vmatmul.mubr.bf16.gmra.mxu0 %v1219_v14  ;;  %1173 = vmatmul.mubr.bf16.gmra.mxu1 %v1227_v15 }
  0x35   : > { %1160 = vmatprep.mubr.bf16.mxu0 %v1220_v16  ;;  %1176 = vmatprep.mubr.bf16.mxu1 %v1228_v17 }
  0x3c   : > { %1161 = vmatmul.mubr.bf16.gmra.mxu0 %v1221_v18  ;;  %1177 = vmatmul.mubr.bf16.gmra.mxu1 %v1229_v19 }
  0x3d   : > { %1164 = vmatprep.mubr.bf16.mxu0 %v1222_v20  ;;  %1180 = vmatprep.mubr.bf16.mxu1 %v1230_v21 }
  0x44   : > { %1165 = vmatmul.mubr.bf16.gmra.mxu0 %v1223_v22  ;;  %1181 = vmatmul.mubr.bf16.gmra.mxu1 %v1231_v23 }
  0xec   : > { %v1154_v24 = vpop.f32.mrf.mxu0  ;;  %v1333_v25 = vpop.f32.mrf.mxu1 }
  0xed   : > { %v1082_v26 = vpack.c.bf16 %v1154_v24, %v1154_v24  ;;  %v1098_v27 = vpack.c.bf16 %v1333_v25, %v1333_v25  ;;  %v807_v36 = vmul.f32 %v1154_v24, %v1154_v24  ;;  %v737_v44 = vsel %vm733_vm1, %v1154_v24, 0.0 }
  0xee   : > { %v445_v28 = vpop.f32.mrf.mxu0  ;;  %v1337_v29 = vpop.f32.mrf.mxu1 }
  0xef   : > { %703 = vst.msk [vmem:[%s1331_s14 + $0x8] sm:$0xf] %vm700_vm0, %v1082_v26  ;;  %v1080_v30 = vpack.c.bf16 %v445_v28, %v445_v28  ;;  %719 = vst.msk [vmem:[%s1331_s14 + $0x48] sm:$0xf] %vm700_vm0, %v1098_v27  ;;  %v1096_v32 = vpack.c.bf16 %v1337_v29, %v1337_v29  ;;  %v805_v34 = vmul.f32 %v445_v28, %v445_v28  ;;  %v734_v40 = vsel %vm733_vm1, %v445_v28, 0.0 }
  0xf0   : > { %v1155_v31 = vpop.f32.mrf.mxu0  ;;  %v1345_v33 = vpop.f32.mrf.mxu1  ;;  %v840_v58 = vsel %vm733_vm1, %v807_v36, 0.0 }
  0xf1   : > { %701 = vst.msk [vmem:[%s1331_s14] sm:$0xf] %vm700_vm0, %v1080_v30  ;;  %v1083_v35 = vpack.c.bf16 %v1155_v31, %v1155_v31  ;;  %717 = vst.msk [vmem:[%s1331_s14 + $0x40] sm:$0xf] %vm700_vm0, %v1096_v32  ;;  %v1099_v38 = vpack.c.bf16 %v1345_v33, %v1345_v33  ;;  %v837_v49 = vsel %vm733_vm1, %v805_v34, 0.0  ;;  %v808_v50 = vmul.f32 %v1155_v31, %v1155_v31 }
  0xf2   : > { %v448_v37 = vpop.f32.mrf.mxu0  ;;  %v1353_v39 = vpop.f32.mrf.mxu1  ;;  %v739_v59 = vsel %vm733_vm1, %v1155_v31, 0.0 }
  0xf3   : > { %704 = vst.msk [vmem:[%s1331_s14 + $0xc] sm:$0xf] %vm700_vm0, %v1083_v35  ;;  %v1081_v41 = vpack.c.bf16 %v448_v37, %v448_v37  ;;  %v735_v42 = vsel %vm733_vm1, %v448_v37, 0.0  ;;  %v806_v43 = vmul.f32 %v448_v37, %v448_v37  ;;  %720 = vst.msk [vmem:[%s1331_s14 + $0x4c] sm:$0xf] %vm700_vm0, %v1099_v38  ;;  %v1097_v47 = vpack.c.bf16 %v1353_v39, %v1353_v39 }
  0xf4   : > { %v736_v45 = vadd.f32 %v735_v42, %v734_v40  ;;  %v1158_v46 = vpop.f32.mrf.mxu0  ;;  %v1364_v48 = vpop.f32.mrf.mxu1  ;;  %v842_v2 = vsel %vm733_vm1, %v808_v50, 0.0 }
  0xf5   : > { %702 = vst.msk [vmem:[%s1331_s14 + $0x4] sm:$0xf] %vm700_vm0, %v1081_v41  ;;  %v838_v51 = vsel %vm733_vm1, %v806_v43, 0.0  ;;  %v1086_v52 = vpack.c.bf16 %v1158_v46, %v1158_v46  ;;  %718 = vst.msk [vmem:[%s1331_s14 + $0x44] sm:$0xf] %vm700_vm0, %v1097_v47  ;;  %v1102_v56 = vpack.c.bf16 %v1364_v48, %v1364_v48  ;;  %v811_v5 = vmul.f32 %v1158_v46, %v1158_v46 }
  0xf6   : > { %v738_v53 = vadd.f32 %v737_v44, %v736_v45  ;;  %v839_v54 = vadd.f32 %v838_v51, %v837_v49  ;;  %v461_v55 = vpop.f32.mrf.mxu0  ;;  %v1374_v57 = vpop.f32.mrf.mxu1  ;;  %v745_v19 = vsel %vm733_vm1, %v1158_v46, 0.0 }
  0xf7   : > { %707 = vst.msk [vmem:[%s1331_s14 + $0x18] sm:$0xf] %vm700_vm0, %v1086_v52  ;;  %v1084_v60 = vpack.c.bf16 %v461_v55, %v461_v55  ;;  %v809_v61 = vmul.f32 %v461_v55, %v461_v55  ;;  %723 = vst.msk [vmem:[%s1331_s14 + $0x58] sm:$0xf] %vm700_vm0, %v1102_v56  ;;  %v741_v3 = vsel %vm733_vm1, %v461_v55, 0.0  ;;  %v1100_v9 = vpack.c.bf16 %v1374_v57, %v1374_v57 }
  0xf8   : > { %v841_v62 = vadd.f32 %v840_v58, %v839_v54  ;;  %v740_v63 = vadd.f32 %v739_v59, %v738_v53  ;;  %v1159_v0 = vpop.f32.mrf.mxu0  ;;  %v1382_v1 = vpop.f32.mrf.mxu1  ;;  %v848_v30 = vsel %vm733_vm1, %v811_v5, 0.0 }
  0xf9   : > { %705 = vst.msk [vmem:[%s1331_s14 + $0x10] sm:$0xf] %vm700_vm0, %v1084_v60  ;;  %v1087_v4 = vpack.c.bf16 %v1159_v0, %v1159_v0  ;;  %v844_v11 = vsel %vm733_vm1, %v809_v61, 0.0  ;;  %721 = vst.msk [vmem:[%s1331_s14 + $0x50] sm:$0xf] %vm700_vm0, %v1100_v9  ;;  %v812_v20 = vmul.f32 %v1159_v0, %v1159_v0  ;;  %v1103_v27 = vpack.c.bf16 %v1382_v1, %v1382_v1 }
  0xfa   : > { %v742_v6 = vadd.f32 %v741_v3, %v740_v63  ;;  %v843_v7 = vadd.f32 %v842_v2, %v841_v62  ;;  %v464_v8 = vpop.f32.mrf.mxu0  ;;  %v1390_v10 = vpop.f32.mrf.mxu1  ;;  %v747_v31 = vsel %vm733_vm1, %v1159_v0, 0.0 }
  0xfb   : > { %708 = vst.msk [vmem:[%s1331_s14 + $0x1c] sm:$0xf] %vm700_vm0, %v1087_v4  ;;  %v1085_v12 = vpack.c.bf16 %v464_v8, %v464_v8  ;;  %v743_v13 = vsel %vm733_vm1, %v464_v8, 0.0  ;;  %v810_v14 = vmul.f32 %v464_v8, %v464_v8  ;;  %724 = vst.msk [vmem:[%s1331_s14 + $0x5c] sm:$0xf] %vm700_vm0, %v1103_v27  ;;  %v850_v40 = vsel %vm733_vm1, %v812_v20, 0.0 }
  0xfc   : > { %v845_v15 = vadd.f32 %v844_v11, %v843_v7  ;;  %v744_v16 = vadd.f32 %v743_v13, %v742_v6  ;;  %v1162_v17 = vpop.f32.mrf.mxu0  ;;  %v1398_v18 = vpop.f32.mrf.mxu1  ;;  %v1101_v47 = vpack.c.bf16 %v1390_v10, %v1390_v10 }
  0xfd   : > { %706 = vst.msk [vmem:[%s1331_s14 + $0x14] sm:$0xf] %vm700_vm0, %v1085_v12  ;;  %v846_v21 = vsel %vm733_vm1, %v810_v14, 0.0  ;;  %v1090_v22 = vpack.c.bf16 %v1162_v17, %v1162_v17  ;;  %v815_v43 = vmul.f32 %v1162_v17, %v1162_v17  ;;  %v753_v59 = vsel %vm733_vm1, %v1162_v17, 0.0 }
  0xfe   : > { %v746_v23 = vadd.f32 %v745_v19, %v744_v16  ;;  %v847_v24 = vadd.f32 %v846_v21, %v845_v15  ;;  %v477_v26 = vpop.f32.mrf.mxu0  ;;  %v1406_v28 = vpop.f32.mrf.mxu1  ;;  %722 = vst.msk [vmem:[%s1331_s14 + $0x54] sm:$0xf] %vm700_vm0, %v1101_v47  ;;  %v1106_v3 = vpack.c.bf16 %v1398_v18, %v1398_v18 }
  0xff   : > { %711 = vst.msk [vmem:[%s1331_s14 + $0x28] sm:$0xf] %vm700_vm0, %v1090_v22  ;;  %v1088_v32 = vpack.c.bf16 %v477_v26, %v477_v26  ;;  %v813_v34 = vmul.f32 %v477_v26, %v477_v26  ;;  %v749_v41 = vsel %vm733_vm1, %v477_v26, 0.0  ;;  %v856_v4 = vsel %vm733_vm1, %v815_v43, 0.0 }
 0x100   : > { %v849_v35 = vadd.f32 %v848_v30, %v847_v24  ;;  %v748_v36 = vadd.f32 %v747_v31, %v746_v23  ;;  %v1163_v37 = vpop.f32.mrf.mxu0  ;;  %v1414_v38 = vpop.f32.mrf.mxu1  ;;  %727 = vst.msk [vmem:[%s1331_s14 + $0x68] sm:$0xf] %vm700_vm0, %v1106_v3  ;;  %v1104_v21 = vpack.c.bf16 %v1406_v28, %v1406_v28  ;;  %v824_v3 = vmul.f32 %v1345_v33, %v1345_v33 }
 0x101   : > { %709 = vst.msk [vmem:[%s1331_s14 + $0x20] sm:$0xf] %vm700_vm0, %v1088_v32  ;;  %v1091_v42 = vpack.c.bf16 %v1163_v37, %v1163_v37  ;;  %v852_v50 = vsel %vm733_vm1, %v813_v34, 0.0  ;;  %v816_v60 = vmul.f32 %v1163_v37, %v1163_v37  ;;  %v755_v5 = vsel %vm733_vm1, %v1163_v37, 0.0 }
 0x102   : > { %v750_v44 = vadd.f32 %v749_v41, %v748_v36  ;;  %v851_v45 = vadd.f32 %v850_v40, %v849_v35  ;;  %v480_v46 = vpop.f32.mrf.mxu0  ;;  %v1422_v49 = vpop.f32.mrf.mxu1  ;;  %725 = vst.msk [vmem:[%s1331_s14 + $0x60] sm:$0xf] %vm700_vm0, %v1104_v21  ;;  %v1107_v36 = vpack.c.bf16 %v1414_v38, %v1414_v38 }
 0x103   : > { %712 = vst.msk [vmem:[%s1331_s14 + $0x2c] sm:$0xf] %vm700_vm0, %v1091_v42  ;;  %v1089_v51 = vpack.c.bf16 %v480_v46, %v480_v46  ;;  %v751_v52 = vsel %vm733_vm1, %v480_v46, 0.0  ;;  %v814_v53 = vmul.f32 %v480_v46, %v480_v46  ;;  %v858_v13 = vsel %vm733_vm1, %v816_v60, 0.0 }
 0x104   : > { %v853_v54 = vadd.f32 %v852_v50, %v851_v45  ;;  %v752_v55 = vadd.f32 %v751_v52, %v750_v44  ;;  %v1166_v56 = vpop.f32.mrf.mxu0  ;;  %v1430_v58 = vpop.f32.mrf.mxu1  ;;  %v1105_v41 = vpack.c.bf16 %v1422_v49, %v1422_v49  ;;  %v821_v44 = vmul.f32 %v1337_v29, %v1337_v29  ;;  %728 = vst.msk [vmem:[%s1331_s14 + $0x6c] sm:$0xf] %vm700_vm0, %v1107_v36 }
 0x105   : > { %710 = vst.msk [vmem:[%s1331_s14 + $0x24] sm:$0xf] %vm700_vm0, %v1089_v51  ;;  %v854_v61 = vsel %vm733_vm1, %v814_v53, 0.0  ;;  %v1094_v62 = vpack.c.bf16 %v1166_v56, %v1166_v56  ;;  %v819_v16 = vmul.f32 %v1166_v56, %v1166_v56  ;;  %v761_v32 = vsel %vm733_vm1, %v1166_v56, 0.0 }
 0x106   : > { %v754_v63 = vadd.f32 %v753_v59, %v752_v55  ;;  %v855_v0 = vadd.f32 %v854_v61, %v853_v54  ;;  %v493_v2 = vpop.f32.mrf.mxu0  ;;  %v1444_v12 = vpop.f32.mrf.mxu1  ;;  %v1110_v45 = vpack.c.bf16 %v1430_v58, %v1430_v58  ;;  %726 = vst.msk [vmem:[%s1331_s14 + $0x64] sm:$0xf] %vm700_vm0, %v1105_v41  ;;  %v765_v52 = vsel %vm733_vm1, %v1337_v29, 0.0 }
 0x107   : > { %715 = vst.msk [vmem:[%s1331_s14 + $0x38] sm:$0xf] %vm700_vm0, %v1094_v62  ;;  %v1092_v6 = vpack.c.bf16 %v493_v2, %v493_v2  ;;  %v817_v7 = vmul.f32 %v493_v2, %v493_v2  ;;  %v757_v14 = vsel %vm733_vm1, %v493_v2, 0.0  ;;  %v864_v42 = vsel %vm733_vm1, %v819_v16, 0.0 }
 0x108   : > { %v857_v8 = vadd.f32 %v856_v4, %v855_v0  ;;  %v756_v9 = vadd.f32 %v755_v5, %v754_v63  ;;  %v1167_v11 = vpop.f32.mrf.mxu0  ;;  %v1458_v31 = vpop.f32.mrf.mxu1  ;;  %v822_v53 = vmul.f32 %v1353_v39, %v1353_v39  ;;  %731 = vst.msk [vmem:[%s1331_s14 + $0x78] sm:$0xf] %vm700_vm0, %v1110_v45  ;;  %v1108_v54 = vpack.c.bf16 %v1444_v12, %v1444_v12 }
 0x109   : > { %713 = vst.msk [vmem:[%s1331_s14 + $0x30] sm:$0xf] %vm700_vm0, %v1092_v6  ;;  %v1095_v15 = vpack.c.bf16 %v1167_v11, %v1167_v11  ;;  %v860_v22 = vsel %vm733_vm1, %v817_v7, 0.0  ;;  %v820_v34 = vmul.f32 %v1167_v11, %v1167_v11  ;;  %v763_v43 = vsel %vm733_vm1, %v1167_v11, 0.0 }
 0x10a   : > { %v758_v17 = vadd.f32 %v757_v14, %v756_v9  ;;  %v859_v19 = vadd.f32 %v858_v13, %v857_v8  ;;  %v496_v20 = vpop.f32.mrf.mxu0  ;;  %v1478_v50 = vpop.f32.mrf.mxu1  ;;  %v1111_v59 = vpack.c.bf16 %v1458_v31, %v1458_v31  ;;  %v823_v60 = vmul.f32 %v1333_v25, %v1333_v25  ;;  %729 = vst.msk [vmem:[%s1331_s14 + $0x70] sm:$0xf] %vm700_vm0, %v1108_v54 }
 0x10b   : > { %716 = vst.msk [vmem:[%s1331_s14 + $0x3c] sm:$0xf] %vm700_vm0, %v1095_v15  ;;  %v1093_v23 = vpack.c.bf16 %v496_v20, %v496_v20  ;;  %v759_v24 = vsel %vm733_vm1, %v496_v20, 0.0  ;;  %v818_v26 = vmul.f32 %v496_v20, %v496_v20  ;;  %v866_v51 = vsel %vm733_vm1, %v820_v34, 0.0 }
 0x10c   : > { %v861_v27 = vadd.f32 %v860_v22, %v859_v19  ;;  %v760_v30 = vadd.f32 %v759_v24, %v758_v17  ;;  %v868_v61 = vsel %vm733_vm1, %v821_v44, 0.0  ;;  %v767_v29 = vsel %vm733_vm1, %v1353_v39, 0.0  ;;  %732 = vst.msk [vmem:[%s1331_s14 + $0x7c] sm:$0xf] %vm700_vm0, %v1111_v59 }
 0x10d   : > { %714 = vst.msk [vmem:[%s1331_s14 + $0x34] sm:$0xf] %vm700_vm0, %v1093_v23  ;;  %v862_v35 = vsel %vm733_vm1, %v818_v26, 0.0  ;;  %v1109_v62 = vpack.c.bf16 %v1478_v50, %v1478_v50  ;;  %v769_v2 = vsel %vm733_vm1, %v1333_v25, 0.0  ;;  %v870_v4 = vsel %vm733_vm1, %v822_v53, 0.0 }
 0x10e   : > { %v762_v37 = vadd.f32 %v761_v32, %v760_v30  ;;  %v863_v40 = vadd.f32 %v862_v35, %v861_v27  ;;  %v872_v6 = vsel %vm733_vm1, %v823_v60, 0.0  ;;  %v771_v7 = vsel %vm733_vm1, %v1345_v33, 0.0 }
 0x10f   : > { %730 = vst.msk [vmem:[%s1331_s14 + $0x74] sm:$0xf] %vm700_vm0, %v1109_v62  ;;  %v825_v8 = vmul.f32 %v1374_v57, %v1374_v57  ;;  %v874_v25 = vsel %vm733_vm1, %v824_v3, 0.0  ;;  %v773_v13 = vsel %vm733_vm1, %v1374_v57, 0.0  ;;  %v826_v14 = vmul.f32 %v1390_v10, %v1390_v10 }
 0x110   : > { %v764_v46 = vadd.f32 %v763_v43, %v762_v37  ;;  %v865_v47 = vadd.f32 %v864_v42, %v863_v40  ;;  %v827_v17 = vmul.f32 %v1364_v48, %v1364_v48  ;;  %v775_v19 = vsel %vm733_vm1, %v1390_v10, 0.0 }
 0x111   : > { %v876_v33 = vsel %vm733_vm1, %v825_v8, 0.0  ;;  %v777_v22 = vsel %vm733_vm1, %v1364_v48, 0.0  ;;  %v828_v57 = vmul.f32 %v1382_v1, %v1382_v1  ;;  %v878_v23 = vsel %vm733_vm1, %v826_v14, 0.0 }
 0x112   : > { %v867_v55 = vadd.f32 %v866_v51, %v865_v47  ;;  %v766_v56 = vadd.f32 %v765_v52, %v764_v46  ;;  %v880_v27 = vsel %vm733_vm1, %v827_v17, 0.0  ;;  %v779_v30 = vsel %vm733_vm1, %v1382_v1, 0.0 }
 0x113   : > { %v829_v10 = vmul.f32 %v1406_v28, %v1406_v28  ;;  %v882_v35 = vsel %vm733_vm1, %v828_v57, 0.0  ;;  %v781_v48 = vsel %vm733_vm1, %v1406_v28, 0.0  ;;  %v830_v36 = vmul.f32 %v1422_v49, %v1422_v49 }
 0x114   : > { %v768_v63 = vadd.f32 %v767_v29, %v766_v56  ;;  %v869_v0 = vadd.f32 %v868_v61, %v867_v55  ;;  %v831_v41 = vmul.f32 %v1398_v18, %v1398_v18  ;;  %v783_v42 = vsel %vm733_vm1, %v1422_v49, 0.0 }
 0x115   : > { %v884_v1 = vsel %vm733_vm1, %v829_v10, 0.0  ;;  %v785_v45 = vsel %vm733_vm1, %v1398_v18, 0.0  ;;  %v832_v28 = vmul.f32 %v1414_v38, %v1414_v38  ;;  %v886_v46 = vsel %vm733_vm1, %v830_v36, 0.0 }
 0x116   : > { %v770_v39 = vadd.f32 %v769_v2, %v768_v63  ;;  %v871_v5 = vadd.f32 %v870_v4, %v869_v0  ;;  %v888_v52 = vsel %vm733_vm1, %v831_v41, 0.0  ;;  %v787_v53 = vsel %vm733_vm1, %v1414_v38, 0.0 }
 0x117   : > { %v833_v49 = vmul.f32 %v1444_v12, %v1444_v12  ;;  %v890_v56 = vsel %vm733_vm1, %v832_v28, 0.0  ;;  %v789_v18 = vsel %vm733_vm1, %v1444_v12, 0.0  ;;  %v834_v59 = vmul.f32 %v1478_v50, %v1478_v50 }
 0x118   : > { %v873_v9 = vadd.f32 %v872_v6, %v871_v5  ;;  %v772_v11 = vadd.f32 %v771_v7, %v770_v39  ;;  %v835_v29 = vmul.f32 %v1430_v58, %v1430_v58  ;;  %v791_v62 = vsel %vm733_vm1, %v1478_v50, 0.0 }
 0x119   : > { %v892_v38 = vsel %vm733_vm1, %v833_v49, 0.0  ;;  %v793_v2 = vsel %vm733_vm1, %v1430_v58, 0.0  ;;  %v836_v12 = vmul.f32 %v1458_v31, %v1458_v31  ;;  %v894_v3 = vsel %vm733_vm1, %v834_v59, 0.0 }
 0x11a   : > { %v774_v15 = vadd.f32 %v773_v13, %v772_v11  ;;  %v875_v16 = vadd.f32 %v874_v25, %v873_v9  ;;  %v896_v5 = vsel %vm733_vm1, %v835_v29, 0.0  ;;  %v795_v6 = vsel %vm733_vm1, %v1458_v31, 0.0 }
 0x11b   : > { %v898_v8 = vsel %vm733_vm1, %v836_v12, 0.0 }
 0x11c   : > { %v877_v20 = vadd.f32 %v876_v33, %v875_v16  ;;  %v776_v21 = vadd.f32 %v775_v19, %v774_v15 }
 0x11e   : > { %v778_v24 = vadd.f32 %v777_v22, %v776_v21  ;;  %v879_v26 = vadd.f32 %v878_v23, %v877_v20 }
 0x120   : > { %v881_v32 = vadd.f32 %v880_v27, %v879_v26  ;;  %v780_v34 = vadd.f32 %v779_v30, %v778_v24 }
 0x122   : > { %v782_v37 = vadd.f32 %v781_v48, %v780_v34  ;;  %v883_v40 = vadd.f32 %v882_v35, %v881_v32 }
 0x124   : > { %v885_v43 = vadd.f32 %v884_v1, %v883_v40  ;;  %v784_v44 = vadd.f32 %v783_v42, %v782_v37 }
 0x126   : > { %v786_v47 = vadd.f32 %v785_v45, %v784_v44  ;;  %v887_v51 = vadd.f32 %v886_v46, %v885_v43 }
 0x128   : > { %v889_v54 = vadd.f32 %v888_v52, %v887_v51  ;;  %v788_v55 = vadd.f32 %v787_v53, %v786_v47 }
 0x12a   : > { %v790_v60 = vadd.f32 %v789_v18, %v788_v55  ;;  %v891_v61 = vadd.f32 %v890_v56, %v889_v54 }
 0x12c   : > { %v893_v63 = vadd.f32 %v892_v38, %v891_v61  ;;  %v792_v0 = vadd.f32 %v791_v62, %v790_v60 }
 0x12e   : > { %v794_v4 = vadd.f32 %v793_v2, %v792_v0  ;;  %v895_v39 = vadd.f32 %v894_v3, %v893_v63 }
 0x130   : > { %v796_v7 = vadd.f32 %v795_v6, %v794_v4  ;;  %v897_v50 = vadd.f32 %v896_v5, %v895_v39 }
 0x132   : > { %v797_v9 = vrot.slane %v796_v7, 4  ;;  %v899_v11 = vadd.f32 %v898_v8, %v897_v50 }
 0x134   : > { %v798_v58 = vadd.f32 %v797_v9, %v796_v7  ;;  %v900_v25 = vrot.slane %v899_v11, 4 }
 0x136   : > { %v799_v13 = vrot.slane %v798_v58, 2  ;;  %v901_v14 = vadd.f32 %v900_v25, %v899_v11 }
 0x138   : > { %v800_v15 = vadd.f32 %v799_v13, %v798_v58  ;;  %v902_v16 = vrot.slane %v901_v14, 2 }
 0x13a   : > { %v801_v17 = vrot.slane %v800_v15, 1  ;;  %v903_v33 = vadd.f32 %v902_v16, %v901_v14 }
 0x13c   : > { %v802_v31 = vadd.f32 %v801_v17, %v800_v15  ;;  %v904_v19 = vrot.slane %v903_v33, 1 }
 0x13e   : > { %804 = vst.msk [vmem:[%s214_s19] sm:$0x1] %vm803_vm2, %v802_v31  ;;  %v905_v20 = vadd.f32 %v904_v19, %v903_v33 }
 0x140   : > { %906 = vst.msk [vmem:[%s217_s22] sm:$0x1] %vm803_vm2, %v905_v20 }
 0x141 PF: > { %s15_s15 = sadd.s32 1, %s1238_s15  }
 0x142   : > { %p12_p5 = scmp.ge.s32.totalorder %s15_s15, 4  }
 0x144   :  { %14 = sbr.rel (!%p12_p5) target bundleno = 1 (0x1), region = 82 }

// kernel: discriminator_forward.9
= control target key start
LH: loop header
LB: loop body
LE: loop exit
PB: predicated region body
PF: predicated region fallthrough
CT: control target
= control target key end

     0   :  { %s789_s12 = smov 0   ;;  %s971_s0 = inlined_call_operand.vmem [shape: bf16[512,16], index: 0, kind: input, shape index: {}]   ;;  %s972_s1 = inlined_call_operand.vmem [shape: f32[1,16], index: 1, kind: input, shape index: {}]   ;;  %s973_s2 = inlined_call_operand.vmem [shape: f32[1,16], index: 2, kind: input, shape index: {}]   ;;  %s974_s3 = inlined_call_operand.vmem [shape: bf16[512,16], index: 3, kind: output, shape index: {}]  }
   0x1 LB: > { %s597_s13 = sadd.s32 4294967295, %s767_s12   ;;  %p601_p0 = scmp.ge.s32.totalorder %s767_s12, 1  ;;  %s767_s12 = sphi %s789_s12, %s13_s12  }
   0x2   : > { %p138_p1 = scmp.lt.s32.totalorder %s767_s12, 3 }
   0x4   : > { %p139_p2 = pnand %p601_p0, %p138_p1 }
   0x5   : > { %s602_s14 = sshll.u32 (!%p139_p2), %s597_s13, 5 }
   0x6   : > { %142 = sbr.rel (%p139_p2) target bundleno = 67 (0x43), region = 32  ;;  %p163_p3 = scmp.lt.s32.totalorder (!%p139_p2), %s602_s14, 63 }
   0xb   : > { %s976_s14 = smov (!%p163_p3, %s602_s14), 63  ;;  %v810_v0 = vld [vmem:[%s972_s1] ss:$0 sm:$0xff]  ;;  %vm508_vm0 = vcmask 125952  }
   0xc   : > { %s603_s15 = sshll.u32 %s976_s14, 2  ;;  %v819_v9 = vld [vmem:[%s973_s2] ss:$0 sm:$0xff] }
   0xd   : > { %s805_s18 = scalar_lea.vmem %s971_s0, %s603_s15  ;;  %s843_s25 = scalar_lea.vmem %s974_s3, %s603_s15 }
   0xe   : > { %v675_v1 = vld [vmem:[%s805_s18] sm:$0xff]   ;;  %v738_v2 = vld [vmem:[%s805_s18 + $0x8] sm:$0xff]   ;;  %v739_v3 = vld [vmem:[%s805_s18 + $0x10] sm:$0xff]  }
   0xf   : > { %v676_v4 = vunpack.c.l.bf16 %v675_v1  ;;  %v677_v5 = vunpack.c.h.bf16 %v675_v1  ;;  %v680_v6 = vunpack.c.l.bf16 %v738_v2  ;;  %v681_v7 = vunpack.c.h.bf16 %v738_v2  ;;  %v740_v8 = vld [vmem:[%s805_s18 + $0x18] sm:$0xff]   ;;  %v741_v22 = vld [vmem:[%s805_s18 + $0x20] sm:$0xff]   ;;  %v742_v47 = vld [vmem:[%s805_s18 + $0x28] sm:$0xff]  }
  0x10   : > { %v684_v10 = vunpack.c.l.bf16 %v739_v3  ;;  %v685_v11 = vunpack.c.h.bf16 %v739_v3  ;;  %v688_v12 = vunpack.c.l.bf16 %v740_v8  ;;  %v689_v13 = vunpack.c.h.bf16 %v740_v8  ;;  %v743_v52 = vld [vmem:[%s805_s18 + $0x30] sm:$0xff]   ;;  %v744_v57 = vld [vmem:[%s805_s18 + $0x38] sm:$0xff]  }
  0x11   : > { %v245_v14 = vmul.f32 %v676_v4, %v810_v0  ;;  %v246_v15 = vmul.f32 %v677_v5, %v810_v0  ;;  %v247_v16 = vmul.f32 %v680_v6, %v810_v0  ;;  %v248_v17 = vmul.f32 %v681_v7, %v810_v0 }
  0x12   : > { %v249_v18 = vmul.f32 %v684_v10, %v810_v0  ;;  %v250_v19 = vmul.f32 %v685_v11, %v810_v0  ;;  %v251_v20 = vmul.f32 %v688_v12, %v810_v0  ;;  %v252_v21 = vmul.f32 %v689_v13, %v810_v0 }
  0x13   : > { %v284_v23 = vadd.f32 %v819_v9, %v245_v14  ;;  %v285_v24 = vadd.f32 %v819_v9, %v246_v15  ;;  %v286_v25 = vadd.f32 %v819_v9, %v247_v16  ;;  %v287_v26 = vadd.f32 %v819_v9, %v248_v17 }
  0x14   : > { %v288_v27 = vadd.f32 %v819_v9, %v249_v18  ;;  %v289_v28 = vadd.f32 %v819_v9, %v250_v19  ;;  %v290_v29 = vadd.f32 %v819_v9, %v251_v20  ;;  %v291_v30 = vadd.f32 %v819_v9, %v252_v21 }
  0x15   : > { %v316_v31 = vmul.f32 0.2, %v284_v23  ;;  %v317_v32 = vmul.f32 0.2, %v285_v24  ;;  %v318_v33 = vmul.f32 0.2, %v286_v25  ;;  %v692_v34 = vunpack.c.l.bf16 %v741_v22 }
  0x16   : > { %v319_v35 = vmul.f32 0.2, %v287_v26  ;;  %v320_v36 = vmul.f32 0.2, %v288_v27  ;;  %v321_v37 = vmul.f32 0.2, %v289_v28  ;;  %v693_v38 = vunpack.c.h.bf16 %v741_v22 }
  0x17   : > { %v348_v39 = vmax.f32 %v284_v23, %v316_v31  ;;  %v349_v40 = vmax.f32 %v285_v24, %v317_v32  ;;  %v350_v41 = vmax.f32 %v286_v25, %v318_v33  ;;  %v322_v42 = vmul.f32 0.2, %v290_v29  ;;  %v745_v24 = vld [vmem:[%s805_s18 + $0x40] sm:$0xff]  }
  0x18   : > { %v351_v43 = vmax.f32 %v287_v26, %v319_v35  ;;  %v352_v44 = vmax.f32 %v288_v27, %v320_v36  ;;  %v353_v45 = vmax.f32 %v289_v28, %v321_v37  ;;  %v323_v46 = vmul.f32 0.2, %v291_v30  ;;  %v746_v37 = vld [vmem:[%s805_s18 + $0x48] sm:$0xff]  }
  0x19   : > { %v642_v48 = vpack.c.bf16 %v348_v39, %v348_v39  ;;  %v643_v49 = vpack.c.bf16 %v349_v40, %v349_v40  ;;  %v644_v50 = vpack.c.bf16 %v350_v41, %v350_v41  ;;  %v354_v51 = vmax.f32 %v290_v29, %v322_v42  ;;  %v747_v42 = vld [vmem:[%s805_s18 + $0x50] sm:$0xff]  }
  0x1a   : > { %v645_v53 = vpack.c.bf16 %v351_v43, %v351_v43  ;;  %v646_v54 = vpack.c.bf16 %v352_v44, %v352_v44  ;;  %v647_v55 = vpack.c.bf16 %v353_v45, %v353_v45  ;;  %v355_v56 = vmax.f32 %v291_v30, %v323_v46 }
  0x1b   : > { %509 = vst.msk [vmem:[%s843_s25] sm:$0xf] %vm508_vm0, %v642_v48  ;;  %510 = vst.msk [vmem:[%s843_s25 + $0x4] sm:$0xf] %vm508_vm0, %v643_v49  ;;  %v648_v58 = vpack.c.bf16 %v354_v51, %v354_v51  ;;  %v253_v59 = vmul.f32 %v692_v34, %v810_v0  ;;  %v254_v60 = vmul.f32 %v693_v38, %v810_v0  ;;  %v696_v61 = vunpack.c.l.bf16 %v742_v47 }
  0x1c   : > { %511 = vst.msk [vmem:[%s843_s25 + $0x8] sm:$0xf] %vm508_vm0, %v644_v50  ;;  %512 = vst.msk [vmem:[%s843_s25 + $0xc] sm:$0xf] %vm508_vm0, %v645_v53  ;;  %v649_v62 = vpack.c.bf16 %v355_v56, %v355_v56  ;;  %v697_v63 = vunpack.c.h.bf16 %v742_v47  ;;  %v700_v1 = vunpack.c.l.bf16 %v743_v52  ;;  %v701_v2 = vunpack.c.h.bf16 %v743_v52  ;;  %v748_v47 = vld [vmem:[%s805_s18 + $0x58] sm:$0xff]  }
  0x1d   : > { %513 = vst.msk [vmem:[%s843_s25 + $0x10] sm:$0xf] %vm508_vm0, %v646_v54  ;;  %514 = vst.msk [vmem:[%s843_s25 + $0x14] sm:$0xf] %vm508_vm0, %v647_v55  ;;  %v292_v3 = vadd.f32 %v819_v9, %v253_v59  ;;  %v293_v4 = vadd.f32 %v819_v9, %v254_v60  ;;  %v255_v5 = vmul.f32 %v696_v61, %v810_v0  ;;  %v704_v6 = vunpack.c.l.bf16 %v744_v57 }
  0x1e   : > { %515 = vst.msk [vmem:[%s843_s25 + $0x18] sm:$0xf] %vm508_vm0, %v648_v58  ;;  %516 = vst.msk [vmem:[%s843_s25 + $0x1c] sm:$0xf] %vm508_vm0, %v649_v62  ;;  %v256_v7 = vmul.f32 %v697_v63, %v810_v0  ;;  %v257_v8 = vmul.f32 %v700_v1, %v810_v0  ;;  %v258_v10 = vmul.f32 %v701_v2, %v810_v0  ;;  %v705_v11 = vunpack.c.h.bf16 %v744_v57 }
  0x1f   : > { %v324_v12 = vmul.f32 0.2, %v292_v3  ;;  %v325_v13 = vmul.f32 0.2, %v293_v4  ;;  %v294_v14 = vadd.f32 %v819_v9, %v255_v5  ;;  %v259_v15 = vmul.f32 %v704_v6, %v810_v0 }
  0x20   : > { %v295_v16 = vadd.f32 %v819_v9, %v256_v7  ;;  %v296_v17 = vadd.f32 %v819_v9, %v257_v8  ;;  %v297_v18 = vadd.f32 %v819_v9, %v258_v10  ;;  %v260_v19 = vmul.f32 %v705_v11, %v810_v0 }
  0x21   : > { %v356_v20 = vmax.f32 %v292_v3, %v324_v12  ;;  %v357_v21 = vmax.f32 %v293_v4, %v325_v13  ;;  %v326_v22 = vmul.f32 0.2, %v294_v14  ;;  %v298_v23 = vadd.f32 %v819_v9, %v259_v15 }
  0x22   : > { %v327_v25 = vmul.f32 0.2, %v295_v16  ;;  %v328_v26 = vmul.f32 0.2, %v296_v17  ;;  %v329_v27 = vmul.f32 0.2, %v297_v18  ;;  %v299_v28 = vadd.f32 %v819_v9, %v260_v19 }
  0x23   : > { %v650_v29 = vpack.c.bf16 %v356_v20, %v356_v20  ;;  %v651_v30 = vpack.c.bf16 %v357_v21, %v357_v21  ;;  %v358_v31 = vmax.f32 %v294_v14, %v326_v22  ;;  %v330_v32 = vmul.f32 0.2, %v298_v23  ;;  %v749_v14 = vld [vmem:[%s805_s18 + $0x60] sm:$0xff]  }
  0x24   : > { %v359_v33 = vmax.f32 %v295_v16, %v327_v25  ;;  %v360_v34 = vmax.f32 %v296_v17, %v328_v26  ;;  %v361_v35 = vmax.f32 %v297_v18, %v329_v27  ;;  %v331_v36 = vmul.f32 0.2, %v299_v28  ;;  %v750_v27 = vld [vmem:[%s805_s18 + $0x68] sm:$0xff]  }
  0x25   : > { %517 = vst.msk [vmem:[%s843_s25 + $0x20] sm:$0xf] %vm508_vm0, %v650_v29  ;;  %518 = vst.msk [vmem:[%s843_s25 + $0x24] sm:$0xf] %vm508_vm0, %v651_v30  ;;  %v652_v38 = vpack.c.bf16 %v358_v31, %v358_v31  ;;  %v362_v39 = vmax.f32 %v298_v23, %v330_v32  ;;  %v708_v40 = vunpack.c.l.bf16 %v745_v24  ;;  %v709_v41 = vunpack.c.h.bf16 %v745_v24  ;;  %v751_v32 = vld [vmem:[%s805_s18 + $0x70] sm:$0xff]  }
  0x26   : > { %v653_v43 = vpack.c.bf16 %v359_v33, %v359_v33  ;;  %v654_v44 = vpack.c.bf16 %v360_v34, %v360_v34  ;;  %v655_v45 = vpack.c.bf16 %v361_v35, %v361_v35  ;;  %v363_v46 = vmax.f32 %v299_v28, %v331_v36 }
  0x27   : > { %519 = vst.msk [vmem:[%s843_s25 + $0x28] sm:$0xf] %vm508_vm0, %v652_v38  ;;  %v656_v48 = vpack.c.bf16 %v362_v39, %v362_v39  ;;  %v261_v49 = vmul.f32 %v708_v40, %v810_v0  ;;  %v262_v50 = vmul.f32 %v709_v41, %v810_v0  ;;  %v712_v51 = vunpack.c.l.bf16 %v746_v37 }
  0x28   : > { %520 = vst.msk [vmem:[%s843_s25 + $0x2c] sm:$0xf] %vm508_vm0, %v653_v43  ;;  %521 = vst.msk [vmem:[%s843_s25 + $0x30] sm:$0xf] %vm508_vm0, %v654_v44  ;;  %v657_v52 = vpack.c.bf16 %v363_v46, %v363_v46  ;;  %v713_v53 = vunpack.c.h.bf16 %v746_v37  ;;  %v716_v54 = vunpack.c.l.bf16 %v747_v42  ;;  %v717_v55 = vunpack.c.h.bf16 %v747_v42  ;;  %v752_v37 = vld [vmem:[%s805_s18 + $0x78] sm:$0xff]  }
  0x29   : > { %522 = vst.msk [vmem:[%s843_s25 + $0x34] sm:$0xf] %vm508_vm0, %v655_v45  ;;  %523 = vst.msk [vmem:[%s843_s25 + $0x38] sm:$0xf] %vm508_vm0, %v656_v48  ;;  %v300_v56 = vadd.f32 %v819_v9, %v261_v49  ;;  %v301_v57 = vadd.f32 %v819_v9, %v262_v50  ;;  %v263_v58 = vmul.f32 %v712_v51, %v810_v0  ;;  %v720_v59 = vunpack.c.l.bf16 %v748_v47 }
  0x2a   : > { %524 = vst.msk [vmem:[%s843_s25 + $0x3c] sm:$0xf] %vm508_vm0, %v657_v52  ;;  %v264_v60 = vmul.f32 %v713_v53, %v810_v0  ;;  %v265_v61 = vmul.f32 %v716_v54, %v810_v0  ;;  %v266_v62 = vmul.f32 %v717_v55, %v810_v0  ;;  %v721_v63 = vunpack.c.h.bf16 %v748_v47 }
  0x2b   : > { %v332_v1 = vmul.f32 0.2, %v300_v56  ;;  %v333_v2 = vmul.f32 0.2, %v301_v57  ;;  %v302_v3 = vadd.f32 %v819_v9, %v263_v58  ;;  %v267_v4 = vmul.f32 %v720_v59, %v810_v0 }
  0x2c   : > { %v303_v5 = vadd.f32 %v819_v9, %v264_v60  ;;  %v304_v6 = vadd.f32 %v819_v9, %v265_v61  ;;  %v305_v7 = vadd.f32 %v819_v9, %v266_v62  ;;  %v268_v8 = vmul.f32 %v721_v63, %v810_v0 }
  0x2d   : > { %v364_v10 = vmax.f32 %v300_v56, %v332_v1  ;;  %v365_v11 = vmax.f32 %v301_v57, %v333_v2  ;;  %v334_v12 = vmul.f32 0.2, %v302_v3  ;;  %v306_v13 = vadd.f32 %v819_v9, %v267_v4 }
  0x2e   : > { %v335_v15 = vmul.f32 0.2, %v303_v5  ;;  %v336_v16 = vmul.f32 0.2, %v304_v6  ;;  %v337_v17 = vmul.f32 0.2, %v305_v7  ;;  %v307_v18 = vadd.f32 %v819_v9, %v268_v8 }
  0x2f   : > { %v658_v19 = vpack.c.bf16 %v364_v10, %v364_v10  ;;  %v659_v20 = vpack.c.bf16 %v365_v11, %v365_v11  ;;  %v366_v21 = vmax.f32 %v302_v3, %v334_v12  ;;  %v338_v22 = vmul.f32 0.2, %v306_v13 }
  0x30   : > { %v367_v23 = vmax.f32 %v303_v5, %v335_v15  ;;  %v368_v24 = vmax.f32 %v304_v6, %v336_v16  ;;  %v369_v25 = vmax.f32 %v305_v7, %v337_v17  ;;  %v339_v26 = vmul.f32 0.2, %v307_v18 }
  0x31   : > { %525 = vst.msk [vmem:[%s843_s25 + $0x40] sm:$0xf] %vm508_vm0, %v658_v19  ;;  %526 = vst.msk [vmem:[%s843_s25 + $0x44] sm:$0xf] %vm508_vm0, %v659_v20  ;;  %v660_v28 = vpack.c.bf16 %v366_v21, %v366_v21  ;;  %v370_v29 = vmax.f32 %v306_v13, %v338_v22  ;;  %v724_v30 = vunpack.c.l.bf16 %v749_v14  ;;  %v725_v31 = vunpack.c.h.bf16 %v749_v14 }
  0x32   : > { %v661_v33 = vpack.c.bf16 %v367_v23, %v367_v23  ;;  %v662_v34 = vpack.c.bf16 %v368_v24, %v368_v24  ;;  %v663_v35 = vpack.c.bf16 %v369_v25, %v369_v25  ;;  %v371_v36 = vmax.f32 %v307_v18, %v339_v26 }
  0x33   : > { %527 = vst.msk [vmem:[%s843_s25 + $0x48] sm:$0xf] %vm508_vm0, %v660_v28  ;;  %v664_v38 = vpack.c.bf16 %v370_v29, %v370_v29  ;;  %v269_v39 = vmul.f32 %v724_v30, %v810_v0  ;;  %v270_v40 = vmul.f32 %v725_v31, %v810_v0  ;;  %v728_v41 = vunpack.c.l.bf16 %v750_v27 }
  0x34   : > { %528 = vst.msk [vmem:[%s843_s25 + $0x4c] sm:$0xf] %vm508_vm0, %v661_v33  ;;  %529 = vst.msk [vmem:[%s843_s25 + $0x50] sm:$0xf] %vm508_vm0, %v662_v34  ;;  %v665_v42 = vpack.c.bf16 %v371_v36, %v371_v36  ;;  %v729_v43 = vunpack.c.h.bf16 %v750_v27  ;;  %v732_v44 = vunpack.c.l.bf16 %v751_v32  ;;  %v733_v45 = vunpack.c.h.bf16 %v751_v32 }
  0x35   : > { %530 = vst.msk [vmem:[%s843_s25 + $0x54] sm:$0xf] %vm508_vm0, %v663_v35  ;;  %531 = vst.msk [vmem:[%s843_s25 + $0x58] sm:$0xf] %vm508_vm0, %v664_v38  ;;  %v308_v46 = vadd.f32 %v819_v9, %v269_v39  ;;  %v309_v47 = vadd.f32 %v819_v9, %v270_v40  ;;  %v271_v48 = vmul.f32 %v728_v41, %v810_v0  ;;  %v736_v49 = vunpack.c.l.bf16 %v752_v37 }
  0x36   : > { %532 = vst.msk [vmem:[%s843_s25 + $0x5c] sm:$0xf] %vm508_vm0, %v665_v42  ;;  %v272_v50 = vmul.f32 %v729_v43, %v810_v0  ;;  %v273_v51 = vmul.f32 %v732_v44, %v810_v0  ;;  %v274_v52 = vmul.f32 %v733_v45, %v810_v0  ;;  %v737_v53 = vunpack.c.h.bf16 %v752_v37 }
  0x37   : > { %v340_v54 = vmul.f32 0.2, %v308_v46  ;;  %v341_v55 = vmul.f32 0.2, %v309_v47  ;;  %v310_v56 = vadd.f32 %v819_v9, %v271_v48  ;;  %v275_v57 = vmul.f32 %v736_v49, %v810_v0 }
  0x38   : > { %v311_v58 = vadd.f32 %v819_v9, %v272_v50  ;;  %v312_v59 = vadd.f32 %v819_v9, %v273_v51  ;;  %v313_v60 = vadd.f32 %v819_v9, %v274_v52  ;;  %v276_v61 = vmul.f32 %v737_v53, %v810_v0 }
  0x39   : > { %v372_v62 = vmax.f32 %v308_v46, %v340_v54  ;;  %v373_v63 = vmax.f32 %v309_v47, %v341_v55  ;;  %v342_v1 = vmul.f32 0.2, %v310_v56  ;;  %v314_v2 = vadd.f32 %v819_v9, %v275_v57 }
  0x3a   : > { %v343_v3 = vmul.f32 0.2, %v311_v58  ;;  %v344_v4 = vmul.f32 0.2, %v312_v59  ;;  %v345_v5 = vmul.f32 0.2, %v313_v60  ;;  %v315_v6 = vadd.f32 %v819_v9, %v276_v61 }
  0x3b   : > { %v666_v7 = vpack.c.bf16 %v372_v62, %v372_v62  ;;  %v667_v8 = vpack.c.bf16 %v373_v63, %v373_v63  ;;  %v374_v10 = vmax.f32 %v310_v56, %v342_v1  ;;  %v346_v11 = vmul.f32 0.2, %v314_v2 }
  0x3c   : > { %v375_v0 = vmax.f32 %v311_v58, %v343_v3  ;;  %v376_v12 = vmax.f32 %v312_v59, %v344_v4  ;;  %v377_v13 = vmax.f32 %v313_v60, %v345_v5  ;;  %v347_v14 = vmul.f32 0.2, %v315_v6 }
  0x3d   : > { %533 = vst.msk [vmem:[%s843_s25 + $0x60] sm:$0xf] %vm508_vm0, %v666_v7  ;;  %534 = vst.msk [vmem:[%s843_s25 + $0x64] sm:$0xf] %vm508_vm0, %v667_v8  ;;  %v668_v15 = vpack.c.bf16 %v374_v10, %v374_v10  ;;  %v378_v9 = vmax.f32 %v314_v2, %v346_v11 }
  0x3e   : > { %v669_v16 = vpack.c.bf16 %v375_v0, %v375_v0  ;;  %v670_v17 = vpack.c.bf16 %v376_v12, %v376_v12  ;;  %v671_v18 = vpack.c.bf16 %v377_v13, %v377_v13  ;;  %v379_v19 = vmax.f32 %v315_v6, %v347_v14 }
  0x3f   : > { %535 = vst.msk [vmem:[%s843_s25 + $0x68] sm:$0xf] %vm508_vm0, %v668_v15  ;;  %v672_v20 = vpack.c.bf16 %v378_v9, %v378_v9 }
  0x40   : > { %536 = vst.msk [vmem:[%s843_s25 + $0x6c] sm:$0xf] %vm508_vm0, %v669_v16  ;;  %537 = vst.msk [vmem:[%s843_s25 + $0x70] sm:$0xf] %vm508_vm0, %v670_v17  ;;  %v673_v21 = vpack.c.bf16 %v379_v19, %v379_v19 }
  0x41   : > { %538 = vst.msk [vmem:[%s843_s25 + $0x74] sm:$0xf] %vm508_vm0, %v671_v18  ;;  %539 = vst.msk [vmem:[%s843_s25 + $0x78] sm:$0xf] %vm508_vm0, %v672_v20 }
  0x42   : > { %540 = vst.msk [vmem:[%s843_s25 + $0x7c] sm:$0xf] %vm508_vm0, %v673_v21 }
  0x43 PF: > { %s13_s12 = sadd.s32 1, %s767_s12  }
  0x44   : > { %p10_p4 = scmp.ge.s32.totalorder %s13_s12, 4  }
  0x46   :  { %12 = sbr.rel (!%p10_p4) target bundleno = 1 (0x1), region = 62 }

// kernel: discriminator_forward.10
= control target key start
LH: loop header
LB: loop body
LE: loop exit
PB: predicated region body
PF: predicated region fallthrough
CT: control target
= control target key end

     0   :  { %s842_s15 = smov 0   ;;  %s966_s0 = inlined_call_operand.vmem [shape: bf16[128,256], index: 0, kind: input, shape index: {}]   ;;  %s967_s1 = inlined_call_operand.vmem [shape: bf16[256,32], index: 1, kind: input, shape index: {}]   ;;  %s968_s2 = inlined_call_operand.vmem [shape: bf16[128,32], index: 2, kind: output, shape index: {0}]   ;;  %s969_s3 = inlined_call_operand.vmem [shape: f32[2,1,32], index: 3, kind: output, shape index: {1}]   ;;  %s970_s4 = inlined_call_operand.vmem [shape: f32[2,1,32], index: 4, kind: output, shape index: {2}]  }
   0x1 LB: > { %s848_s16 = sadd.s32 4294967295, %s815_s15   ;;  %p668_p0 = scmp.ge.s32.totalorder %s815_s15, 1  ;;  %s815_s15 = sphi %s842_s15, %s15_s15  }
   0x2   : > { %p169_p1 = scmp.lt.s32.totalorder %s815_s15, 3 }
   0x4   : > { %p170_p2 = pnand %p668_p0, %p169_p1 }
   0x5   : > { %s669_s19 = sshll.u32 (!%p170_p2), %s848_s16, 3  ;;  %p215_p4 = scmp.lt.s32.totalorder (!%p170_p2), %s848_s16, 1 }
   0x6   : > { %173 = sbr.rel (%p170_p2) target bundleno = 279 (0x117), region = 28  ;;  %p203_p3 = scmp.lt.s32.totalorder (!%p170_p2), %s669_s19, 15 }
   0xb   : > { %v781_v0 = vld [vmem:[%s967_s1 + $0x78] sm:$0xff]   ;;  %v783_v2 = vld [vmem:[%s967_s1 + $0x70] sm:$0xff]   ;;  %v785_v4 = vld [vmem:[%s967_s1 + $0x68] sm:$0xff]   ;;  %s972_s19 = smov (!%p203_p3, %s669_s19), 15  ;;  %vm495_vm0 = vcmask 257024   ;;  %vm504_vm1 = vcmask 261120  }
   0xc   : > { %v782_v1 = vld [vmem:[%s967_s1 + $0x38] sm:$0xff]   ;;  %717 = vmatprep.subr.bf16.mxu0 %v781_v0  ;;  %757 = vmatprep.subr.bf16.mxu1 %v781_v0  ;;  %v784_v3 = vld [vmem:[%s967_s1 + $0x30] sm:$0xff]   ;;  %v786_v5 = vld [vmem:[%s967_s1 + $0x28] sm:$0xff]   ;;  %s708_s8 = sshll.u32 %s972_s19, 3  ;;  %s673_s5 = sshll.u32 %s972_s19, 2  ;;  %vm526_vm2 = vcmask 253952  }
   0xd   : > { %718 = vmatpush3.bf16.msra.mxu0 %v782_v1  ;;  %765 = vmatpush3.bf16.msra.mxu1 %v782_v1  ;;  %v787_v6 = vld [vmem:[%s967_s1 + $0x60] sm:$0xff]   ;;  %v789_v8 = vld [vmem:[%s967_s1 + $0x58] sm:$0xff]   ;;  %s886_s13 = scalar_lea.vmem %s966_s0, %s708_s8  ;;  %v791_v10 = vld [vmem:[%s967_s1 + $0x50] sm:$0xff]   ;;  %s921_s8 = scalar_lea.vmem %s968_s2, %s673_s5 }
   0xe   : > { %719 = vmatprep.subr.bf16.mxu0 %v783_v2  ;;  %758 = vmatprep.subr.bf16.mxu1 %v783_v2  ;;  %v788_v7 = vld [vmem:[%s967_s1 + $0x20] sm:$0xff]   ;;  %v790_v9 = vld [vmem:[%s967_s1 + $0x18] sm:$0xff]   ;;  %v792_v13 = vld [vmem:[%s967_s1 + $0x10] sm:$0xff]   ;;  %s974_s16 = smov (!%p215_p4, %s848_s16), 1 }
   0xf   : > { %v799_v11 = vld [vmem:[%s886_s13 + $0x4] ss:$8 sps:$4 sm:$0xff]   ;;  %v797_v18 = vld [vmem:[%s886_s13] ss:$8 sps:$4 sm:$0xff]   ;;  %v803_v20 = vld [vmem:[%s886_s13 + $0x14] ss:$8 sps:$4 sm:$0xff]   ;;  %s217_s10 = scalar_lea.vmem %s969_s3, %s974_s16 }
  0x10   : > { %v802_v12 = vld [vmem:[%s886_s13 + $0x24] ss:$8 sps:$4 sm:$0xff]   ;;  %430 = vmatprep.mubr.bf16.mxu0 %v799_v11  ;;  %v800_v19 = vld [vmem:[%s886_s13 + $0x20] ss:$8 sps:$4 sm:$0xff]   ;;  %v806_v21 = vld [vmem:[%s886_s13 + $0x34] ss:$8 sps:$4 sm:$0xff]  }
  0x11   : > { %720 = vmatpush3.bf16.msra.mxu0 %v784_v3  ;;  %766 = vmatpush3.bf16.msra.mxu1 %v784_v3  ;;  %v793_v14 = vld [vmem:[%s967_s1 + $0x48] sm:$0xff]   ;;  %v795_v16 = vld [vmem:[%s967_s1 + $0x40] sm:$0xff]   ;;  %v805_v22 = vld [vmem:[%s886_s13 + $0x10] ss:$8 sps:$4 sm:$0xff]  }
  0x12   : > { %721 = vmatprep.subr.bf16.mxu0 %v785_v4  ;;  %759 = vmatprep.subr.bf16.mxu1 %v785_v4  ;;  %v794_v15 = vld [vmem:[%s967_s1 + $0x8] sm:$0xff]   ;;  %v796_v17 = vld [vmem:[%s967_s1] sm:$0xff]   ;;  %v808_v23 = vld [vmem:[%s886_s13 + $0x30] ss:$8 sps:$4 sm:$0xff]   ;;  %s220_s13 = scalar_lea.vmem %s970_s4, %s974_s16 }
  0x13   : > { %446 = vmatprep.mubr.bf16.mxu1 %v802_v12 }
  0x15   : > { %722 = vmatpush3.bf16.msra.mxu0 %v786_v5  ;;  %767 = vmatpush3.bf16.msra.mxu1 %v786_v5 }
  0x16   : > { %723 = vmatprep.subr.bf16.mxu0 %v787_v6  ;;  %760 = vmatprep.subr.bf16.mxu1 %v787_v6 }
  0x19   : > { %724 = vmatpush3.bf16.msra.mxu0 %v788_v7  ;;  %768 = vmatpush3.bf16.msra.mxu1 %v788_v7 }
  0x1a   : > { %725 = vmatprep.subr.bf16.mxu0 %v789_v8  ;;  %761 = vmatprep.subr.bf16.mxu1 %v789_v8 }
  0x1d   : > { %726 = vmatpush3.bf16.msra.mxu0 %v790_v9  ;;  %769 = vmatpush3.bf16.msra.mxu1 %v790_v9 }
  0x1e   : > { %727 = vmatprep.subr.bf16.mxu0 %v791_v10  ;;  %762 = vmatprep.subr.bf16.mxu1 %v791_v10 }
  0x21   : > { %728 = vmatpush3.bf16.msra.mxu0 %v792_v13  ;;  %770 = vmatpush3.bf16.msra.mxu1 %v792_v13 }
  0x22   : > { %729 = vmatprep.subr.bf16.mxu0 %v793_v14  ;;  %763 = vmatprep.subr.bf16.mxu1 %v793_v14 }
  0x25   : > { %730 = vmatpush3.bf16.msra.mxu0 %v794_v15  ;;  %771 = vmatpush3.bf16.msra.mxu1 %v794_v15 }
  0x26   : > { %731 = vmatprep.subr.bf16.mxu0 %v795_v16  ;;  %764 = vmatprep.subr.bf16.mxu1 %v795_v16 }
  0x29   : > { %732 = vmatpush3.bf16.msra.mxu0 %v796_v17  ;;  %772 = vmatpush3.bf16.msra.mxu1 %v796_v17 }
  0x2c   : > { %431 = vmatmul.mubr.bf16.vlgmr.msra.gmra.mxu0 %v797_v18  ;;  %447 = vmatmul.mubr.bf16.vlgmr.msra.gmra.mxu1 %v800_v19 }
  0x2d   : > { %438 = vmatprep.mubr.bf16.mxu0 %v803_v20  ;;  %454 = vmatprep.mubr.bf16.mxu1 %v806_v21 }
  0x34   : > { %439 = vmatmul.mubr.bf16.gmra.mxu0 %v805_v22  ;;  %455 = vmatmul.mubr.bf16.gmra.mxu1 %v808_v23 }
  0xec   : > { %v733_v24 = vpop.f32.mrf.mxu0  ;;  %v745_v25 = vpop.f32.mrf.mxu1 }
  0xee   : > { %v734_v26 = vpop.f32.mrf.mxu0  ;;  %v746_v27 = vpop.f32.mrf.mxu1 }
  0xef   : > { %v735_v28 = vadd.f32 %v734_v26, %v733_v24  ;;  %v747_v29 = vadd.f32 %v746_v27, %v745_v25 }
  0xf0   : > { %v736_v30 = vpop.f32.mrf.mxu0  ;;  %v748_v31 = vpop.f32.mrf.mxu1 }
  0xf1   : > { %v709_v32 = vpack.c.bf16 %v735_v28, %v735_v28  ;;  %v713_v33 = vpack.c.bf16 %v747_v29, %v747_v29  ;;  %v528_v45 = vmul.f32 %v735_v28, %v735_v28  ;;  %v505_v49 = vsel %vm504_vm1, %v735_v28, 0.0 }
  0xf2   : > { %v737_v34 = vpop.f32.mrf.mxu0  ;;  %v749_v35 = vpop.f32.mrf.mxu1  ;;  %v532_v0 = vmul.f32 %v747_v29, %v747_v29  ;;  %v512_v9 = vsel %vm504_vm1, %v747_v29, 0.0 }
  0xf3   : > { %496 = vst.msk [vmem:[%s921_s8] sm:$0xf] %vm495_vm0, %v709_v32  ;;  %500 = vst.msk [vmem:[%s921_s8 + $0x10] sm:$0xf] %vm495_vm0, %v713_v33  ;;  %v738_v36 = vadd.f32 %v737_v34, %v736_v30  ;;  %v750_v37 = vadd.f32 %v749_v35, %v748_v31  ;;  %v536_v60 = vsel %vm504_vm1, %v528_v45, 0.0 }
  0xf4   : > { %v739_v38 = vpop.f32.mrf.mxu0  ;;  %v751_v39 = vpop.f32.mrf.mxu1  ;;  %v543_v14 = vsel %vm504_vm1, %v532_v0, 0.0 }
  0xf5   : > { %v710_v40 = vpack.c.bf16 %v738_v36, %v738_v36  ;;  %v529_v41 = vmul.f32 %v738_v36, %v738_v36  ;;  %v714_v42 = vpack.c.bf16 %v750_v37, %v750_v37  ;;  %v506_v46 = vsel %vm504_vm1, %v738_v36, 0.0 }
  0xf6   : > { %v740_v43 = vpop.f32.mrf.mxu0  ;;  %v752_v44 = vpop.f32.mrf.mxu1  ;;  %v507_v57 = vadd.f32 %v506_v46, %v505_v49  ;;  %v533_v10 = vmul.f32 %v750_v37, %v750_v37  ;;  %v514_v15 = vsel %vm504_vm1, %v750_v37, 0.0 }
  0xf7   : > { %497 = vst.msk [vmem:[%s921_s8 + $0x4] sm:$0xf] %vm495_vm0, %v710_v40  ;;  %501 = vst.msk [vmem:[%s921_s8 + $0x14] sm:$0xf] %vm495_vm0, %v714_v42  ;;  %v741_v47 = vadd.f32 %v740_v43, %v739_v38  ;;  %v753_v48 = vadd.f32 %v752_v44, %v751_v39  ;;  %v537_v50 = vsel %vm504_vm1, %v529_v41, 0.0 }
  0xf8   : > { %v742_v51 = vpop.f32.mrf.mxu0  ;;  %v754_v52 = vpop.f32.mrf.mxu1  ;;  %v538_v1 = vadd.f32 %v537_v50, %v536_v60  ;;  %v545_v19 = vsel %vm504_vm1, %v533_v10, 0.0 }
  0xf9   : > { %v711_v53 = vpack.c.bf16 %v741_v47, %v741_v47  ;;  %v508_v54 = vsel %vm504_vm1, %v741_v47, 0.0  ;;  %v530_v55 = vmul.f32 %v741_v47, %v741_v47  ;;  %v715_v56 = vpack.c.bf16 %v753_v48, %v753_v48 }
  0xfa   : > { %v743_v58 = vpop.f32.mrf.mxu0  ;;  %v755_v59 = vpop.f32.mrf.mxu1  ;;  %v509_v2 = vadd.f32 %v508_v54, %v507_v57  ;;  %v534_v16 = vmul.f32 %v753_v48, %v753_v48  ;;  %v516_v20 = vsel %vm504_vm1, %v753_v48, 0.0 }
  0xfb   : > { %498 = vst.msk [vmem:[%s921_s8 + $0x8] sm:$0xf] %vm495_vm0, %v711_v53  ;;  %v539_v61 = vsel %vm504_vm1, %v530_v55, 0.0  ;;  %502 = vst.msk [vmem:[%s921_s8 + $0x18] sm:$0xf] %vm495_vm0, %v715_v56  ;;  %v744_v62 = vadd.f32 %v743_v58, %v742_v51  ;;  %v756_v63 = vadd.f32 %v755_v59, %v754_v52 }
  0xfc   : > { %v540_v7 = vadd.f32 %v539_v61, %v538_v1  ;;  %v547_v24 = vsel %vm504_vm1, %v534_v16, 0.0 }
  0xfd   : > { %v712_v3 = vpack.c.bf16 %v744_v62, %v744_v62  ;;  %v510_v4 = vsel %vm504_vm1, %v744_v62, 0.0  ;;  %v531_v5 = vmul.f32 %v744_v62, %v744_v62  ;;  %v716_v6 = vpack.c.bf16 %v756_v63, %v756_v63 }
  0xfe   : > { %v511_v8 = vadd.f32 %v510_v4, %v509_v2  ;;  %v535_v21 = vmul.f32 %v756_v63, %v756_v63  ;;  %v518_v25 = vsel %vm504_vm1, %v756_v63, 0.0 }
  0xff   : > { %499 = vst.msk [vmem:[%s921_s8 + $0xc] sm:$0xf] %vm495_vm0, %v712_v3  ;;  %v541_v11 = vsel %vm504_vm1, %v531_v5, 0.0  ;;  %503 = vst.msk [vmem:[%s921_s8 + $0x1c] sm:$0xf] %vm495_vm0, %v716_v6 }
 0x100   : > { %v513_v12 = vadd.f32 %v512_v9, %v511_v8  ;;  %v542_v13 = vadd.f32 %v541_v11, %v540_v7  ;;  %v549_v28 = vsel %vm504_vm1, %v535_v21, 0.0 }
 0x102   : > { %v544_v17 = vadd.f32 %v543_v14, %v542_v13  ;;  %v515_v18 = vadd.f32 %v514_v15, %v513_v12 }
 0x104   : > { %v517_v22 = vadd.f32 %v516_v20, %v515_v18  ;;  %v546_v23 = vadd.f32 %v545_v19, %v544_v17 }
 0x106   : > { %v519_v26 = vadd.f32 %v518_v25, %v517_v22  ;;  %v548_v27 = vadd.f32 %v547_v24, %v546_v23 }
 0x108   : > { %v520_v29 = vrot.slane %v519_v26, 4  ;;  %v550_v30 = vadd.f32 %v549_v28, %v548_v27 }
 0x10a   : > { %v521_v31 = vadd.f32 %v520_v29, %v519_v26  ;;  %v551_v32 = vrot.slane %v550_v30, 4 }
 0x10c   : > { %v522_v33 = vrot.slane %v521_v31, 2  ;;  %v552_v34 = vadd.f32 %v551_v32, %v550_v30 }
 0x10e   : > { %v523_v35 = vadd.f32 %v522_v33, %v521_v31  ;;  %v553_v36 = vrot.slane %v552_v34, 2 }
 0x110   : > { %v524_v37 = vrot.slane %v523_v35, 1  ;;  %v554_v38 = vadd.f32 %v553_v36, %v552_v34 }
 0x112   : > { %v525_v39 = vadd.f32 %v524_v37, %v523_v35  ;;  %v555_v40 = vrot.slane %v554_v38, 1 }
 0x114   : > { %527 = vst.msk [vmem:[%s217_s10] sm:$0x1] %vm526_vm2, %v525_v39  ;;  %v556_v41 = vadd.f32 %v555_v40, %v554_v38 }
 0x116   : > { %557 = vst.msk [vmem:[%s220_s13] sm:$0x1] %vm526_vm2, %v556_v41 }
 0x117 PF: > { %s15_s15 = sadd.s32 1, %s815_s15  }
 0x118   : > { %p12_p5 = scmp.ge.s32.totalorder %s15_s15, 4  }
 0x11a   :  { %14 = sbr.rel (!%p12_p5) target bundleno = 1 (0x1), region = 82 }

// kernel: discriminator_forward.11
= control target key start
LH: loop header
LB: loop body
LE: loop exit
PB: predicated region body
PF: predicated region fallthrough
CT: control target
= control target key end

     0   :  { %s417_s12 = smov 0   ;;  %s455_s0 = inlined_call_operand.vmem [shape: bf16[128,32], index: 0, kind: input, shape index: {}]   ;;  %s456_s1 = inlined_call_operand.vmem [shape: f32[1,32], index: 1, kind: input, shape index: {}]   ;;  %s457_s2 = inlined_call_operand.vmem [shape: f32[1,32], index: 2, kind: input, shape index: {}]   ;;  %s458_s3 = inlined_call_operand.vmem [shape: bf16[128,32], index: 3, kind: output, shape index: {}]  }
   0x1 LB: > { %s333_s13 = sadd.s32 4294967295, %s395_s12   ;;  %p337_p0 = scmp.ge.s32.totalorder %s395_s12, 1  ;;  %s395_s12 = sphi %s417_s12, %s13_s12  }
   0x2   : > { %p138_p1 = scmp.lt.s32.totalorder %s395_s12, 3 }
   0x4   : > { %p139_p2 = pnand %p337_p0, %p138_p1 }
   0x5   : > { %s338_s14 = sshll.u32 (!%p139_p2), %s333_s13, 3 }
   0x6   : > { %142 = sbr.rel (%p139_p2) target bundleno = 31 (0x1f), region = 32  ;;  %p163_p3 = scmp.lt.s32.totalorder (!%p139_p2), %s338_s14, 15 }
   0xb   : > { %s460_s14 = smov (!%p163_p3, %s338_s14), 15  ;;  %v342_v0 = vld [vmem:[%s456_s1] ss:$0 sm:$0xff]  ;;  %vm268_vm0 = vcmask 257024  }
   0xc   : > { %s339_s15 = sshll.u32 %s460_s14, 2  ;;  %v343_v9 = vld [vmem:[%s457_s2] ss:$0 sm:$0xff] }
   0xd   : > { %s166_s18 = scalar_lea.vmem %s455_s0, %s339_s15  ;;  %s172_s25 = scalar_lea.vmem %s458_s3, %s339_s15 }
   0xe   : > { %v363_v1 = vld [vmem:[%s166_s18] sm:$0xff]   ;;  %v378_v2 = vld [vmem:[%s166_s18 + $0x8] sm:$0xff]   ;;  %v379_v3 = vld [vmem:[%s166_s18 + $0x10] sm:$0xff]  }
   0xf   : > { %v364_v4 = vunpack.c.l.bf16 %v363_v1  ;;  %v365_v5 = vunpack.c.h.bf16 %v363_v1  ;;  %v368_v6 = vunpack.c.l.bf16 %v378_v2  ;;  %v369_v7 = vunpack.c.h.bf16 %v378_v2  ;;  %v380_v8 = vld [vmem:[%s166_s18 + $0x18] sm:$0xff]  }
  0x10   : > { %v372_v10 = vunpack.c.l.bf16 %v379_v3  ;;  %v373_v11 = vunpack.c.h.bf16 %v379_v3  ;;  %v376_v12 = vunpack.c.l.bf16 %v380_v8  ;;  %v377_v13 = vunpack.c.h.bf16 %v380_v8 }
  0x11   : > { %v197_v14 = vmul.f32 %v364_v4, %v342_v0  ;;  %v198_v15 = vmul.f32 %v365_v5, %v342_v0  ;;  %v199_v16 = vmul.f32 %v368_v6, %v342_v0  ;;  %v200_v17 = vmul.f32 %v369_v7, %v342_v0 }
  0x12   : > { %v201_v18 = vmul.f32 %v372_v10, %v342_v0  ;;  %v202_v19 = vmul.f32 %v373_v11, %v342_v0  ;;  %v203_v20 = vmul.f32 %v376_v12, %v342_v0  ;;  %v204_v21 = vmul.f32 %v377_v13, %v342_v0 }
  0x13   : > { %v212_v22 = vadd.f32 %v343_v9, %v197_v14  ;;  %v213_v23 = vadd.f32 %v343_v9, %v198_v15  ;;  %v214_v24 = vadd.f32 %v343_v9, %v199_v16  ;;  %v215_v25 = vadd.f32 %v343_v9, %v200_v17 }
  0x14   : > { %v216_v26 = vadd.f32 %v343_v9, %v201_v18  ;;  %v217_v27 = vadd.f32 %v343_v9, %v202_v19  ;;  %v218_v28 = vadd.f32 %v343_v9, %v203_v20  ;;  %v219_v29 = vadd.f32 %v343_v9, %v204_v21 }
  0x15   : > { %v220_v30 = vmul.f32 0.2, %v212_v22  ;;  %v221_v31 = vmul.f32 0.2, %v213_v23  ;;  %v222_v32 = vmul.f32 0.2, %v214_v24 }
  0x16   : > { %v223_v33 = vmul.f32 0.2, %v215_v25  ;;  %v224_v34 = vmul.f32 0.2, %v216_v26  ;;  %v225_v35 = vmul.f32 0.2, %v217_v27 }
  0x17   : > { %v228_v36 = vmax.f32 %v212_v22, %v220_v30  ;;  %v229_v37 = vmax.f32 %v213_v23, %v221_v31  ;;  %v230_v38 = vmax.f32 %v214_v24, %v222_v32  ;;  %v226_v39 = vmul.f32 0.2, %v218_v28 }
  0x18   : > { %v231_v40 = vmax.f32 %v215_v25, %v223_v33  ;;  %v232_v41 = vmax.f32 %v216_v26, %v224_v34  ;;  %v233_v42 = vmax.f32 %v217_v27, %v225_v35  ;;  %v227_v43 = vmul.f32 0.2, %v219_v29 }
  0x19   : > { %v354_v44 = vpack.c.bf16 %v228_v36, %v228_v36  ;;  %v355_v45 = vpack.c.bf16 %v229_v37, %v229_v37  ;;  %v356_v46 = vpack.c.bf16 %v230_v38, %v230_v38  ;;  %v234_v47 = vmax.f32 %v218_v28, %v226_v39 }
  0x1a   : > { %v357_v48 = vpack.c.bf16 %v231_v40, %v231_v40  ;;  %v358_v49 = vpack.c.bf16 %v232_v41, %v232_v41  ;;  %v359_v50 = vpack.c.bf16 %v233_v42, %v233_v42  ;;  %v235_v51 = vmax.f32 %v219_v29, %v227_v43 }
  0x1b   : > { %269 = vst.msk [vmem:[%s172_s25] sm:$0xf] %vm268_vm0, %v354_v44  ;;  %270 = vst.msk [vmem:[%s172_s25 + $0x4] sm:$0xf] %vm268_vm0, %v355_v45  ;;  %v360_v52 = vpack.c.bf16 %v234_v47, %v234_v47 }
  0x1c   : > { %271 = vst.msk [vmem:[%s172_s25 + $0x8] sm:$0xf] %vm268_vm0, %v356_v46  ;;  %272 = vst.msk [vmem:[%s172_s25 + $0xc] sm:$0xf] %vm268_vm0, %v357_v48  ;;  %v361_v53 = vpack.c.bf16 %v235_v51, %v235_v51 }
  0x1d   : > { %273 = vst.msk [vmem:[%s172_s25 + $0x10] sm:$0xf] %vm268_vm0, %v358_v49  ;;  %274 = vst.msk [vmem:[%s172_s25 + $0x14] sm:$0xf] %vm268_vm0, %v359_v50 }
  0x1e   : > { %275 = vst.msk [vmem:[%s172_s25 + $0x18] sm:$0xf] %vm268_vm0, %v360_v52  ;;  %276 = vst.msk [vmem:[%s172_s25 + $0x1c] sm:$0xf] %vm268_vm0, %v361_v53 }
  0x1f PF: > { %s13_s12 = sadd.s32 1, %s395_s12  }
  0x20   : > { %p10_p4 = scmp.ge.s32.totalorder %s13_s12, 4  }
  0x22   :  { %12 = sbr.rel (!%p10_p4) target bundleno = 1 (0x1), region = 62 }

// kernel: discriminator_forward.12
= control target key start
LH: loop header
LB: loop body
LE: loop exit
PB: predicated region body
PF: predicated region fallthrough
CT: control target
= control target key end

     0   :  { %s899_s15 = smov 0   ;;  %s1027_s0 = inlined_call_operand.vmem [shape: bf16[32,512], index: 0, kind: input, shape index: {}]   ;;  %s1028_s1 = inlined_call_operand.vmem [shape: bf16[512,128], index: 1, kind: input, shape index: {}]   ;;  %s1029_s2 = inlined_call_operand.vmem [shape: bf16[32,128], index: 2, kind: output, shape index: {0}]   ;;  %s1030_s3 = inlined_call_operand.vmem [shape: f32[2,1,128], index: 3, kind: output, shape index: {1}]   ;;  %s1031_s4 = inlined_call_operand.vmem [shape: f32[2,1,128], index: 4, kind: output, shape index: {2}]  }
   0x1 LB: > { %s905_s16 = sadd.s32 4294967295, %s872_s15   ;;  %p722_p0 = scmp.ge.s32.totalorder %s872_s15, 1  ;;  %s872_s15 = sphi %s899_s15, %s15_s15  }
   0x2   : > { %p169_p1 = scmp.lt.s32.totalorder %s872_s15, 3 }
   0x4   : > { %p170_p2 = pnand %p722_p0, %p169_p1 }
   0x5   : > { %s723_s25 = sshll.u32 (!%p170_p2), %s905_s16, 1  ;;  %p215_p4 = scmp.lt.s32.totalorder (!%p170_p2), %s905_s16, 1 }
   0x6   : > { %173 = sbr.rel (%p170_p2) target bundleno = 266 (0x10a), region = 28  ;;  %p203_p3 = scmp.lt.s32.totalorder (!%p170_p2), %s723_s25, 3 }
   0xb   : > { %v828_v0 = vld [vmem:[%s1028_s1 + $0x78] sm:$0xff]   ;;  %v832_v4 = vld [vmem:[%s1028_s1 + $0x70] sm:$0xff]   ;;  %v836_v8 = vld [vmem:[%s1028_s1 + $0x68] sm:$0xff]   ;;  %s1033_s25 = smov (!%p203_p3, %s723_s25), 3  ;;  %s1035_s16 = smov (!%p215_p4, %s905_s16), 1 }
   0xc   : > { %v829_v1 = vld [vmem:[%s1028_s1 + $0xf8] sm:$0xff]   ;;  %776 = vmatprep.subr.bf16.mxu0 %v828_v0  ;;  %v833_v5 = vld [vmem:[%s1028_s1 + $0xf0] sm:$0xff]   ;;  %v837_v9 = vld [vmem:[%s1028_s1 + $0xe8] sm:$0xff]   ;;  %s768_s24 = sshll.u32 %s1033_s25, 4  ;;  %s727_s13 = sshll.u32 %s1033_s25, 2 }
   0xd   : > { %v830_v2 = vld [vmem:[%s1028_s1 + $0x38] sm:$0xff]   ;;  %798 = vmatprep.subr.bf16.mxu1 %v829_v1  ;;  %v834_v6 = vld [vmem:[%s1028_s1 + $0x30] sm:$0xff]   ;;  %v838_v10 = vld [vmem:[%s1028_s1 + $0x28] sm:$0xff]   ;;  %s207_s8 = scalar_lea.vmem %s1027_s0, %s768_s24  ;;  %s213_s18 = scalar_lea.vmem %s1029_s2, %s727_s13 }
   0xe   : > { %v831_v3 = vld [vmem:[%s1028_s1 + $0xb8] sm:$0xff]   ;;  %777 = vmatpush3.bf16.msra.mxu0 %v830_v2  ;;  %v835_v7 = vld [vmem:[%s1028_s1 + $0xb0] sm:$0xff]   ;;  %v839_v11 = vld [vmem:[%s1028_s1 + $0xa8] sm:$0xff]   ;;  %s217_s20 = scalar_lea.vmem %s1030_s3, %s1035_s16  ;;  %s220_s23 = scalar_lea.vmem %s1031_s4, %s1035_s16 }
   0xf   : > { %799 = vmatpush3.bf16.msra.mxu1 %v831_v3  ;;  %778 = vmatprep.subr.bf16.mxu0 %v832_v4  ;;  %v840_v12 = vld [vmem:[%s1028_s1 + $0x60] sm:$0xff]   ;;  %v844_v16 = vld [vmem:[%s1028_s1 + $0x58] sm:$0xff]   ;;  %v848_v20 = vld [vmem:[%s1028_s1 + $0x50] sm:$0xff]  }
  0x10   : > { %800 = vmatprep.subr.bf16.mxu1 %v833_v5  ;;  %v841_v13 = vld [vmem:[%s1028_s1 + $0xe0] sm:$0xff]   ;;  %v845_v17 = vld [vmem:[%s1028_s1 + $0xd8] sm:$0xff]   ;;  %v849_v21 = vld [vmem:[%s1028_s1 + $0xd0] sm:$0xff]  }
  0x11   : > { %v842_v14 = vld [vmem:[%s1028_s1 + $0x20] sm:$0xff]   ;;  %v846_v18 = vld [vmem:[%s1028_s1 + $0x18] sm:$0xff]   ;;  %v850_v22 = vld [vmem:[%s1028_s1 + $0x10] sm:$0xff]  }
  0x12   : > { %779 = vmatpush3.bf16.msra.mxu0 %v834_v6  ;;  %v843_v15 = vld [vmem:[%s1028_s1 + $0xa0] sm:$0xff]   ;;  %v847_v19 = vld [vmem:[%s1028_s1 + $0x98] sm:$0xff]   ;;  %v851_v23 = vld [vmem:[%s1028_s1 + $0x90] sm:$0xff]  }
  0x13   : > { %801 = vmatpush3.bf16.msra.mxu1 %v835_v7  ;;  %780 = vmatprep.subr.bf16.mxu0 %v836_v8  ;;  %v852_v24 = vld [vmem:[%s1028_s1 + $0x48] sm:$0xff]   ;;  %v856_v28 = vld [vmem:[%s1028_s1 + $0x40] sm:$0xff]  }
  0x14   : > { %802 = vmatprep.subr.bf16.mxu1 %v837_v9  ;;  %v853_v25 = vld [vmem:[%s1028_s1 + $0xc8] sm:$0xff]   ;;  %v857_v29 = vld [vmem:[%s1028_s1 + $0xc0] sm:$0xff]  }
  0x15   : > { %v854_v26 = vld [vmem:[%s1028_s1 + $0x8] sm:$0xff]   ;;  %v858_v30 = vld [vmem:[%s1028_s1] sm:$0xff]  }
  0x16   : > { %781 = vmatpush3.bf16.msra.mxu0 %v838_v10  ;;  %v855_v27 = vld [vmem:[%s1028_s1 + $0x88] sm:$0xff]   ;;  %v859_v31 = vld [vmem:[%s1028_s1 + $0x80] sm:$0xff]  }
  0x17   : > { %803 = vmatpush3.bf16.msra.mxu1 %v839_v11  ;;  %782 = vmatprep.subr.bf16.mxu0 %v840_v12  ;;  %v860_v32 = vld [vmem:[%s207_s8] ss:$16 sps:$4 sm:$0xff]   ;;  %v862_v33 = vld [vmem:[%s207_s8 + $0x4] ss:$16 sps:$4 sm:$0xff]   ;;  %v863_v34 = vld [vmem:[%s207_s8 + $0x8] ss:$16 sps:$4 sm:$0xff]  }
  0x18   : > { %804 = vmatprep.subr.bf16.mxu1 %v841_v13  ;;  %v865_v35 = vld [vmem:[%s207_s8 + $0xc] ss:$16 sps:$4 sm:$0xff]   ;;  %534 = vmatprep.mubr.bf16.mxu0 %v862_v33 }
  0x19   : > { %575 = vmatprep.mubr.bf16.mxu1 %v865_v35 }
  0x1a   : > { %783 = vmatpush3.bf16.msra.mxu0 %v842_v14 }
  0x1b   : > { %805 = vmatpush3.bf16.msra.mxu1 %v843_v15  ;;  %784 = vmatprep.subr.bf16.mxu0 %v844_v16 }
  0x1c   : > { %806 = vmatprep.subr.bf16.mxu1 %v845_v17 }
  0x1e   : > { %785 = vmatpush3.bf16.msra.mxu0 %v846_v18 }
  0x1f   : > { %807 = vmatpush3.bf16.msra.mxu1 %v847_v19  ;;  %786 = vmatprep.subr.bf16.mxu0 %v848_v20 }
  0x20   : > { %808 = vmatprep.subr.bf16.mxu1 %v849_v21 }
  0x22   : > { %787 = vmatpush3.bf16.msra.mxu0 %v850_v22 }
  0x23   : > { %809 = vmatpush3.bf16.msra.mxu1 %v851_v23  ;;  %788 = vmatprep.subr.bf16.mxu0 %v852_v24 }
  0x24   : > { %810 = vmatprep.subr.bf16.mxu1 %v853_v25 }
  0x26   : > { %789 = vmatpush3.bf16.msra.mxu0 %v854_v26 }
  0x27   : > { %811 = vmatpush3.bf16.msra.mxu1 %v855_v27  ;;  %790 = vmatprep.subr.bf16.mxu0 %v856_v28 }
  0x28   : > { %812 = vmatprep.subr.bf16.mxu1 %v857_v29 }
  0x2a   : > { %791 = vmatpush3.bf16.msra.mxu0 %v858_v30 }
  0x2b   : > { %813 = vmatpush3.bf16.msra.mxu1 %v859_v31 }
  0x2d   : > { %535 = vmatmul.mubr.bf16.vlgmr.msra.gmra.mxu0 %v860_v32 }
  0x2e   : > { %576 = vmatmul.mubr.bf16.vlgmr.msra.gmra.mxu1 %v863_v34 }
  0xed   : > { %v792_v36 = vpop.f32.mrf.mxu0 }
  0xee   : > { %v814_v37 = vpop.f32.mrf.mxu1 }
  0xef   : > { %v793_v38 = vpop.f32.mrf.mxu0 }
  0xf0   : > { %v815_v39 = vpop.f32.mrf.mxu1  ;;  %v794_v40 = vadd.f32 %v793_v38, %v792_v36 }
  0xf1   : > { %v816_v41 = vadd.f32 %v815_v39, %v814_v37  ;;  %v795_v42 = vpop.f32.mrf.mxu0 }
  0xf2   : > { %v817_v43 = vpop.f32.mrf.mxu1 }
  0xf3   : > { %v796_v44 = vpop.f32.mrf.mxu0  ;;  %v578_v47 = vadd.f32 %v816_v41, %v794_v40 }
  0xf4   : > { %v797_v45 = vadd.f32 %v796_v44, %v795_v42  ;;  %v818_v46 = vpop.f32.mrf.mxu1 }
  0xf5   : > { %v819_v48 = vadd.f32 %v818_v46, %v817_v43  ;;  %v602_v50 = vmul.f32 %v578_v47, %v578_v47 }
  0xf7   : > { %v581_v49 = vadd.f32 %v819_v48, %v797_v45 }
  0xf9   : > { %v774_v51 = vpack.c.bf16 %v581_v49, %v578_v47  ;;  %v594_v52 = vadd.f32 %v581_v49, %v578_v47  ;;  %v603_v53 = vmul.f32 %v581_v49, %v581_v49 }
  0xfb   : > { %775 = vst [vmem:[%s213_s18] sm:$0xff] %v774_v51   ;;  %v595_v54 = vrot.slane %v594_v52, 4  ;;  %v604_v55 = vadd.f32 %v603_v53, %v602_v50 }
  0xfd   : > { %v596_v56 = vadd.f32 %v595_v54, %v594_v52  ;;  %v605_v57 = vrot.slane %v604_v55, 4 }
  0xff   : > { %v597_v58 = vrot.slane %v596_v56, 2  ;;  %v606_v59 = vadd.f32 %v605_v57, %v604_v55 }
 0x101   : > { %v598_v60 = vadd.f32 %v597_v58, %v596_v56  ;;  %v607_v61 = vrot.slane %v606_v59, 2 }
 0x103   : > { %v599_v62 = vrot.slane %v598_v60, 1  ;;  %v608_v63 = vadd.f32 %v607_v61, %v606_v59 }
 0x105   : > { %v600_v0 = vadd.f32 %v599_v62, %v598_v60  ;;  %v609_v1 = vrot.slane %v608_v63, 1 }
 0x107   : > { %601 = vst [vmem:[%s217_s20] sm:$0x1] %v600_v0  ;;  %v610_v2 = vadd.f32 %v609_v1, %v608_v63 }
 0x109   : > { %611 = vst [vmem:[%s220_s23] sm:$0x1] %v610_v2 }
 0x10a PF: > { %s15_s15 = sadd.s32 1, %s872_s15  }
 0x10b   : > { %p12_p5 = scmp.ge.s32.totalorder %s15_s15, 4  }
 0x10d   :  { %14 = sbr.rel (!%p12_p5) target bundleno = 1 (0x1), region = 82 }

// kernel: discriminator_forward.13
= control target key start
LH: loop header
LB: loop body
LE: loop exit
PB: predicated region body
PF: predicated region fallthrough
CT: control target
= control target key end

     0   :  { %v192_v0 = vmov 0.0   ;;  %vm193_vm0 = vmmov 0   ;;  %vm67_vm1 = vcmask 261120   ;;  %vm141_vm2 = vcmask 1041408   ;;  %s254_s0 = inlined_call_operand.vmem [shape: bf16[32,128], index: 0, kind: input, shape index: {}]   ;;  %s255_s1 = inlined_call_operand.vmem [shape: f32[1,128], index: 1, kind: input, shape index: {}]   ;;  %s256_s2 = inlined_call_operand.vmem [shape: f32[1,128], index: 2, kind: input, shape index: {}]   ;;  %s257_s3 = inlined_call_operand.vmem [shape: f32[32,128], index: 3, kind: input, shape index: {}]   ;;  %s258_s4 = inlined_call_operand.vmem [shape: f32[2,32], index: 4, kind: input, shape index: {}]   ;;  %s259_s5 = inlined_call_operand.vmem [shape: f32[2,1], index: 5, kind: output, shape index: {}]  }
   0x1   :  { %175 = vmatprep.subr.mxu0 %v192_v0  ;;  %v162_v1 = vld [vmem:[%s254_s0] sm:$0xff]   ;;  %v169_v2 = vld [vmem:[%s254_s0 + $0x8] sm:$0xff]   ;;  %183 = vmatprep.mubr.msk.f32.mxu0 %vm193_vm0, %v192_v0  ;;  %v61_v20 = vld [vmem:[%s257_s3 + $0x18] sm:$0xff]  ;;  %vm151_vm3 = vcmask 1024  }
   0x2   :  { %v157_v3 = vld [vmem:[%s255_s1] ss:$0 sm:$0xff]  ;;  %v167_v4 = vunpack.c.l.bf16 %v169_v2  ;;  %v168_v5 = vunpack.c.h.bf16 %v169_v2  ;;  %v164_v6 = vunpack.c.h.bf16 %v162_v1  ;;  %v163_v7 = vunpack.c.l.bf16 %v162_v1  ;;  %v60_v21 = vld [vmem:[%s257_s3 + $0x10] sm:$0xff]  ;;  %v59_v26 = vld [vmem:[%s257_s3 + $0x8] sm:$0xff] }
   0x3   :  { %v158_v8 = vld [vmem:[%s256_s2] ss:$0 sm:$0xff] }
   0x4   :  { %v38_v9 = vmul.f32 %v168_v5, %v157_v3  ;;  %v37_v10 = vmul.f32 %v167_v4, %v157_v3  ;;  %v36_v11 = vmul.f32 %v164_v6, %v157_v3  ;;  %v35_v12 = vmul.f32 %v163_v7, %v157_v3  ;;  %v58_v30 = vld [vmem:[%s257_s3] sm:$0xff] }
   0x5   :  { %v66_v33 = vld [vmem:[%s258_s4] sm:$0x3] }
   0x6   :  { %v49_v13 = vadd.f32 %v158_v8, %v38_v9  ;;  %v48_v14 = vadd.f32 %v158_v8, %v37_v10  ;;  %v47_v15 = vadd.f32 %v158_v8, %v36_v11  ;;  %v46_v16 = vadd.f32 %v158_v8, %v35_v12 }
   0x8   :  { %v53_v17 = vmul.f32 0.2, %v49_v13  ;;  %v52_v18 = vmul.f32 0.2, %v48_v14  ;;  %v51_v19 = vmul.f32 0.2, %v47_v15 }
   0x9   :  { %v50_v22 = vmul.f32 0.2, %v46_v16 }
   0xa   :  { %v57_v23 = vmax.f32 %v49_v13, %v53_v17  ;;  %v56_v24 = vmax.f32 %v48_v14, %v52_v18  ;;  %v55_v25 = vmax.f32 %v47_v15, %v51_v19 }
   0xb   :  { %v54_v29 = vmax.f32 %v46_v16, %v50_v22 }
   0xc   :  { %v65_v27 = vmul.f32 %v61_v20, %v57_v23  ;;  %v64_v28 = vmul.f32 %v60_v21, %v56_v24  ;;  %v63_v31 = vmul.f32 %v59_v26, %v55_v25 }
   0xd   :  { %v62_v32 = vmul.f32 %v58_v30, %v54_v29 }
   0xe   :  { %176 = vmatpush3.msra.mxu0 %v65_v27 }
   0xf   :  { %177 = vmatprep.subr.mxu0 %v192_v0 }
  0x10   :  { %178 = vmatpush3.msra.mxu0 %v64_v28 }
  0x11   :  { %179 = vmatprep.subr.mxu0 %v192_v0 }
  0x12   :  { %180 = vmatpush3.msra.mxu0 %v63_v31 }
  0x13   :  { %181 = vmatprep.subr.mxu0 %v192_v0 }
  0x14   :  { %182 = vmatpush3.msra.mxu0 %v62_v32 }
  0x15   :  { %184 = vmatmul.mubr.msk.f32.vlgmr.msra.gmra.mxu0 %vm67_vm1, %v66_v33 }
  0xd5   :  { %v137_v34 = vpop.f32.mrf.mxu0 }
  0xd6   :  { %v142_v35 = vsel %vm141_vm2, %v137_v34, 0.0 }
  0xd7   :  { %v185_v36 = vpop.f32.mrf.mxu0  ;;  %143 = vadd.xlane.f32.xlu0 %v142_v35 }
 0x160   :  { %v144_v37 = vpop.xlane.xlu0 %143 }
 0x161   :  { %v160_v38 = vmul.f32 -1.442695, %v144_v37 }
 0x163   :  { %188 = vpow2.f32 %v160_v38 }
 0x170   :  { %v189_v39 = vpop.eup %188 }
 0x171   :  { %v148_v40 = vadd.f32 1.0, %v189_v39 }
 0x173   :  { %190 = vrcp.f32 %v148_v40 }
 0x180   :  { %v191_v41 = vpop.eup %190 }
 0x181   :  { %152 = vst.msk [vmem:[%s259_s5] sm:$0x3] %vm151_vm3, %v191_v41 }

</bundles_post_ra>
